<compile_context>
chip_gen: v7x
topology: tpu7x:2x2x1
jax: 0.10.0
libtpu: 0.0.40
codegen_flags: <defaults>
</compile_context>

<pallas_src>
import functools

import jax
import jax.numpy as jnp
from jax import lax
from jax.experimental import pallas as pl
from jax.experimental.pallas import tpu as pltpu

HIDDEN = 512
BN_EPS = 1e-5


def _round_up(v, m):
    return (v + m - 1) // m * m


# ---------------------------------------------------------------------------
# Fused path: MLP + training-mode BatchNorm in a single VMEM-resident kernel
# ---------------------------------------------------------------------------
def _fused_mlp_bn_kernel(x_ref, w1_ref, b1_ref, w2_ref, b2_ref, w3_ref,
                         gamma_ref, beta_ref, o_ref, *, true_b):
    # bf16 MXU operands, f32 accumulation; elementwise (bias + ReLU) in f32.
    h1 = jnp.dot(x_ref[...].astype(jnp.bfloat16), w1_ref[...],
                 preferred_element_type=jnp.float32)
    h1 = jnp.maximum(h1 + b1_ref[...], 0.0)
    h2 = jnp.dot(h1.astype(jnp.bfloat16), w2_ref[...],
                 preferred_element_type=jnp.float32)
    h2 = jnp.maximum(h2 + b2_ref[...], 0.0)
    y = jnp.dot(h2.astype(jnp.bfloat16), w3_ref[...],
                preferred_element_type=jnp.float32)
    # Final Linear bias (b3) intentionally omitted — it cancels exactly in
    # training-mode BatchNorm's (y - mean).

    # Training-mode BatchNorm over the batch axis; padded rows masked out.
    # Two-pass (centered) variance: everything is VMEM-resident, so this is
    # cheap and avoids the one-pass cancellation problem.
    bp = y.shape[0]
    row = lax.broadcasted_iota(jnp.int32, (bp, 1), 0)
    valid = row < true_b
    inv_n = 1.0 / true_b
    mean = jnp.sum(jnp.where(valid, y, 0.0), axis=0, keepdims=True) * inv_n
    centered = jnp.where(valid, y - mean, 0.0)
    var = jnp.sum(centered * centered, axis=0, keepdims=True) * inv_n  # biased
    inv_std = lax.rsqrt(var + BN_EPS)          # EUP slot, essentially free
    scale = gamma_ref[...] * inv_std
    shift = beta_ref[...] - mean * scale
    o_ref[...] = (y * scale + shift).astype(o_ref.dtype)


# ---------------------------------------------------------------------------
# Two-stage fallback, stage 1: MLP + masked partial BN stats (per batch tile)
# ---------------------------------------------------------------------------
def _mlp_stage_kernel(x_ref, w1_ref, b1_ref, w2_ref, b2_ref, w3_ref,
                      y_ref, psum_ref, psumsq_ref, *, true_b, tb):
    h1 = jnp.dot(x_ref[...].astype(jnp.bfloat16), w1_ref[...],
                 preferred_element_type=jnp.float32)
    h1 = jnp.maximum(h1 + b1_ref[...], 0.0)
    h2 = jnp.dot(h1.astype(jnp.bfloat16), w2_ref[...],
                 preferred_element_type=jnp.float32)
    h2 = jnp.maximum(h2 + b2_ref[...], 0.0)
    y = jnp.dot(h2.astype(jnp.bfloat16), w3_ref[...],
                preferred_element_type=jnp.float32)        # f32 accumulator

    # One-pass partial statistics on the f32 accumulator, masking padded rows.
    row = pl.program_id(0) * tb + lax.broadcasted_iota(jnp.int32, (tb, 1), 0)
    valid = row < true_b
    ym = jnp.where(valid, y, 0.0)
    psum_ref[...] = jnp.sum(ym, axis=0, keepdims=True)[None]        # (1,1,out_p)
    psumsq_ref[...] = jnp.sum(ym * ym, axis=0, keepdims=True)[None]

    # Intermediate travels through HBM as bf16 (halves the round-trip bytes).
    y_ref[...] = y.astype(y_ref.dtype)


# ---------------------------------------------------------------------------
# Two-stage fallback, stage 2: combine stats + apply BN affine (fused)
# ---------------------------------------------------------------------------
def _bn_apply_kernel(y_ref, psum_ref, psumsq_ref, gamma_ref, beta_ref, o_ref,
                     *, true_b):
    total = jnp.sum(psum_ref[...], axis=0)        # (1, out_p)
    totalsq = jnp.sum(psumsq_ref[...], axis=0)    # (1, out_p)
    inv_n = 1.0 / true_b
    mean = total * inv_n
    # TODO(synk): one-pass variance is cancellation-prone for outputs with a
    # large mean/std ratio; fine for this randomly-initialized inversion MLP.
    var = jnp.maximum(totalsq * inv_n - mean * mean, 0.0)  # biased (training)
    inv_std = lax.rsqrt(var + BN_EPS)
    scale = gamma_ref[...] * inv_std
    shift = beta_ref[...] - mean * scale
    o_ref[...] = (y_ref[...].astype(jnp.float32) * scale + shift).astype(o_ref.dtype)


# ---------------------------------------------------------------------------
# Wrapper
# ---------------------------------------------------------------------------
def textual_inversion_mlp(x, params, *, block_b=512, fused_batch_limit=1024,
                          force_two_stage=False):
    """x: (B, in_dim) f32.  params: dict of weights.  Returns (B, out_dim) f32."""
    B, in_dim = x.shape
    out_dim = params["w3"].shape[1]
    f32, bf16 = jnp.float32, jnp.bfloat16

    # Lane-dense outputs: pad the feature dim to a multiple of 128.
    out_p = _round_up(out_dim, 128)

    w1 = params["w1"].astype(bf16)
    w2 = params["w2"].astype(bf16)
    w3 = jnp.pad(params["w3"], ((0, 0), (0, out_p - out_dim))).astype(bf16)
    b1 = params["b1"].reshape(1, HIDDEN).astype(f32)
    b2 = params["b2"].reshape(1, HIDDEN).astype(f32)
    gamma = jnp.pad(params["gamma"].reshape(1, -1),
                    ((0, 0), (0, out_p - out_dim))).astype(f32)
    beta = jnp.pad(params["beta"].reshape(1, -1),
                   ((0, 0), (0, out_p - out_dim))).astype(f32)

    mlp_flops = 2 * (in_dim * HIDDEN + HIDDEN * HIDDEN + HIDDEN * out_p)
    weight_bytes = (w1.size + w2.size + w3.size) * 2 + (b1.size + b2.size) * 4

    if not force_two_stage and B <= fused_batch_limit:
        # ------------------------------------------------------------------
        # Fused single kernel: x/weights/activations all VMEM-resident; no y
        # round trip, no inter-kernel XLA dispatches.  (At these batch sizes
        # the problem is latency-dominated, so v7x multi-core splitting of a
        # ~10 MFLOP kernel is not worthwhile.)
        # ------------------------------------------------------------------
        bp = _round_up(B, 8)                       # sublane alignment
        x_p = x.astype(f32)
        if bp != B:
            x_p = jnp.pad(x_p, ((0, bp - B), (0, 0)))

        cost = pl.CostEstimate(
            flops=bp * mlp_flops,
            transcendentals=out_p,
            bytes_accessed=bp * in_dim * 4 + weight_bytes
                           + (gamma.size + beta.size) * 4 + bp * out_p * 4)
        out = pl.pallas_call(
            functools.partial(_fused_mlp_bn_kernel, true_b=B),
            out_shape=jax.ShapeDtypeStruct((bp, out_p), f32),
            compiler_params=pltpu.CompilerParams(
                vmem_limit_bytes=(32 * 1024 * 1024 if bp >= 512 else None)),
            cost_estimate=cost,
        )(x_p, w1, b1, w2, b2, w3, gamma, beta)
    else:
        # ------------------------------------------------------------------
        # Two-stage fallback for batches too large to keep resident in VMEM.
        # ------------------------------------------------------------------
        # Batch tile: sublane aligned, capped so the "parallel" axis has at
        # least 2 blocks (keeps both v7x TensorCores busy).
        tb = max(8, min(_round_up(block_b, 8), _round_up((B + 1) // 2, 8)))
        g = pl.cdiv(B, tb)
        bp = g * tb

        x_p = x.astype(f32)
        if bp != B:
            x_p = jnp.pad(x_p, ((0, bp - B), (0, 0)))

        rep2 = lambda i: (0, 0)      # replicated 2-D blocks (weights, gamma/beta)
        rep3 = lambda i: (0, 0, 0)   # replicated 3-D blocks (partial stats)

        # Per-step VMEM at tb=512 is ~12 MB; raise the scoped-VMEM cap for big
        # tiles, small tiles stay within every generation's default.
        compiler_params = pltpu.CompilerParams(
            dimension_semantics=("parallel",),
            vmem_limit_bytes=(32 * 1024 * 1024 if tb >= 256 else None))

        stage1_cost = pl.CostEstimate(
            flops=bp * mlp_flops,
            transcendentals=0,
            bytes_accessed=bp * in_dim * 4 + weight_bytes
                           + bp * out_p * 2 + 2 * g * out_p * 4)
        y16, psum, psumsq = pl.pallas_call(
            functools.partial(_mlp_stage_kernel, true_b=B, tb=tb),
            out_shape=(jax.ShapeDtypeStruct((bp, out_p), bf16),
                       jax.ShapeDtypeStruct((g, 1, out_p), f32),
                       jax.ShapeDtypeStruct((g, 1, out_p), f32)),
            grid_spec=pltpu.PrefetchScalarGridSpec(
                num_scalar_prefetch=0,
                grid=(g,),
                in_specs=[pl.BlockSpec((tb, in_dim), lambda i: (i, 0)),
                          pl.BlockSpec((in_dim, HIDDEN), rep2),
                          pl.BlockSpec((1, HIDDEN), rep2),
                          pl.BlockSpec((HIDDEN, HIDDEN), rep2),
                          pl.BlockSpec((1, HIDDEN), rep2),
                          pl.BlockSpec((HIDDEN, out_p), rep2)],
                out_specs=[pl.BlockSpec((tb, out_p), lambda i: (i, 0)),
                           pl.BlockSpec((1, 1, out_p), lambda i: (i, 0, 0)),
                           pl.BlockSpec((1, 1, out_p), lambda i: (i, 0, 0))]),
            compiler_params=compiler_params,
            cost_estimate=stage1_cost,
        )(x_p, w1, b1, w2, b2, w3)

        stage2_cost = pl.CostEstimate(
            flops=2 * bp * out_p + 6 * g * out_p,
            transcendentals=out_p,
            bytes_accessed=bp * out_p * 2 + 2 * g * out_p * 4
                           + (gamma.size + beta.size) * 4 + bp * out_p * 4)
        out = pl.pallas_call(
            functools.partial(_bn_apply_kernel, true_b=B),
            out_shape=jax.ShapeDtypeStruct((bp, out_p), f32),
            grid_spec=pltpu.PrefetchScalarGridSpec(
                num_scalar_prefetch=0,
                grid=(g,),
                in_specs=[pl.BlockSpec((tb, out_p), lambda i: (i, 0)),
                          pl.BlockSpec((g, 1, out_p), rep3),
                          pl.BlockSpec((g, 1, out_p), rep3),
                          pl.BlockSpec((1, out_p), rep2),
                          pl.BlockSpec((1, out_p), rep2)],
                out_specs=pl.BlockSpec((tb, out_p), lambda i: (i, 0))),
            compiler_params=compiler_params,
            cost_estimate=stage2_cost,
        )(y16, psum, psumsq, gamma, beta)

    # Skip the (separate XLA copy) trailing slice when nothing was padded.
    if bp == B and out_p == out_dim:
        return out
    return out[:B, :out_dim]


# ---------------------------------------------------------------------------
# Params + reference
# ---------------------------------------------------------------------------
def init_params(key, in_dim, out_dim):
    """Deterministic synthetic init (PyTorch Linear-style uniform bounds)."""
    ks = jax.random.split(key, 8)

    def linear(kw, kb, fan_in, fan_out):
        bound = 1.0 / jnp.sqrt(float(fan_in))
        w = jax.random.uniform(kw, (fan_in, fan_out), jnp.float32, -bound, bound)
        b = jax.random.uniform(kb, (1, fan_out), jnp.float32, -bound, bound)
        return w, b

    w1, b1 = linear(ks[0], ks[1], in_dim, HIDDEN)
    w2, b2 = linear(ks[2], ks[3], HIDDEN, HIDDEN)
    w3, b3 = linear(ks[4], ks[5], HIDDEN, out_dim)
    # PyTorch BN init is gamma=1, beta=0; perturb slightly so the affine path
    # is actually exercised by the tests.
    gamma = 1.0 + 0.1 * jax.random.uniform(ks[6], (1, out_dim), jnp.float32, -1.0, 1.0)
    beta = 0.1 * jax.random.normal(ks[7], (1, out_dim), jnp.float32)
    return dict(w1=w1, b1=b1, w2=w2, b2=b2, w3=w3, b3=b3, gamma=gamma, beta=beta)


def reference(x, p):
    """Pure-JAX reference with matching bf16 MXU operands (keeps b3 to show
    it cancels under training-mode BatchNorm)."""
    bf16 = jnp.bfloat16
    h1 = jnp.maximum(jnp.dot(x.astype(bf16), p["w1"].astype(bf16),
                             preferred_element_type=jnp.float32) + p["b1"], 0.0)
    h2 = jnp.maximum(jnp.dot(h1.astype(bf16), p["w2"].astype(bf16),
                             preferred_element_type=jnp.float32) + p["b2"], 0.0)
    y = jnp.dot(h2.astype(bf16), p["w3"].astype(bf16),
                preferred_element_type=jnp.float32) + p["b3"]
    mean = jnp.mean(y, axis=0, keepdims=True)
    var = jnp.mean((y - mean) ** 2, axis=0, keepdims=True)
    return (y - mean) / jnp.sqrt(var + BN_EPS) * p["gamma"] + p["beta"]


if __name__ == "__main__":
    key = jax.random.PRNGKey(0)
    k1, k2, k3, k4 = jax.random.split(key, 4)

    # Test 1: primary fused path, small CLIP-like shapes.
    # B=6 exercises batch padding + masked BN statistics inside the kernel.
    B, in_dim, out_dim = 6, 512, 512
    x = jax.random.normal(k1, (B, in_dim), jnp.float32)
    params = init_params(k2, in_dim, out_dim)
    out = jax.block_until_ready(textual_inversion_mlp(x, params))
    ref = reference(x, params)
    assert out.shape == (B, out_dim)
    assert bool(jnp.allclose(out, ref, atol=5e-3, rtol=5e-3)), "fused path mismatch"

    # Test 2: two-stage fallback (forced), multi-block grid + batch & feature
    # padding.  Looser tolerance: intermediate y travels through HBM as bf16.
    B2, in_dim2, out_dim2 = 40, 512, 200
    x2 = jax.random.normal(k3, (B2, in_dim2), jnp.float32)
    params2 = init_params(k4, in_dim2, out_dim2)
    out2 = jax.block_until_ready(
        textual_inversion_mlp(x2, params2, block_b=16, force_two_stage=True))
    ref2 = reference(x2, params2)
    assert out2.shape == (B2, out_dim2)
    assert bool(jnp.allclose(out2, ref2, atol=2e-2, rtol=2e-2)), "two-stage path mismatch"

    print("KERNEL_OK")
</pallas_src>

<mosaic_0001>
module attributes {stable_mosaic.version = 11 : i64} {
  func.func @_fused_mlp_bn_kernel(%arg0: memref<8x512xf32, #tpu.memory_space<vmem>>, %arg1: memref<512x512xbf16, #tpu.memory_space<vmem>>, %arg2: memref<1x512xf32, #tpu.memory_space<vmem>>, %arg3: memref<512x512xbf16, #tpu.memory_space<vmem>>, %arg4: memref<1x512xf32, #tpu.memory_space<vmem>>, %arg5: memref<512x512xbf16, #tpu.memory_space<vmem>>, %arg6: memref<1x512xf32, #tpu.memory_space<vmem>>, %arg7: memref<1x512xf32, #tpu.memory_space<vmem>>, %arg8: memref<8x512xf32, #tpu.memory_space<vmem>>) attributes {dimension_semantics = [], scalar_prefetch = 0 : i64, scratch_operands = 0 : i64, tpu.core_type = #tpu.core_type<tc>} {
    %c0 = arith.constant 0 : index
    %c0_0 = arith.constant 0 : index
    %0 = vector.load %arg0[%c0, %c0_0] : memref<8x512xf32, #tpu.memory_space<vmem>>, vector<8x512xf32>
    %1 = arith.truncf %0 : vector<8x512xf32> to vector<8x512xbf16>
    %c0_1 = arith.constant 0 : index
    %c0_2 = arith.constant 0 : index
    %2 = vector.load %arg1[%c0_1, %c0_2] : memref<512x512xbf16, #tpu.memory_space<vmem>>, vector<512x512xbf16>
    %cst = arith.constant dense<0.000000e+00> : vector<8x512xf32>
    %3 = tpu.matmul %1, %2, %cst {dimension_numbers = #tpu.dot_dimension_numbers<[1], [0], [0], [1], [0, 0, 1, 1], [], []>} : vector<8x512xbf16>, vector<512x512xbf16>, vector<8x512xf32> -> vector<8x512xf32>
    %c0_3 = arith.constant 0 : index
    %c0_4 = arith.constant 0 : index
    %4 = vector.load %arg2[%c0_3, %c0_4] : memref<1x512xf32, #tpu.memory_space<vmem>>, vector<1x512xf32>
    %5 = vector.broadcast %4 : vector<1x512xf32> to vector<8x512xf32>
    %6 = arith.addf %3, %5 : vector<8x512xf32>
    %cst_5 = arith.constant 0.000000e+00 : f32
    %7 = vector.broadcast %cst_5 : f32 to vector<8x512xf32>
    %8 = arith.maximumf %6, %7 : vector<8x512xf32>
    %9 = arith.truncf %8 : vector<8x512xf32> to vector<8x512xbf16>
    %c0_6 = arith.constant 0 : index
    %c0_7 = arith.constant 0 : index
    %10 = vector.load %arg3[%c0_6, %c0_7] : memref<512x512xbf16, #tpu.memory_space<vmem>>, vector<512x512xbf16>
    %cst_8 = arith.constant dense<0.000000e+00> : vector<8x512xf32>
    %11 = tpu.matmul %9, %10, %cst_8 {dimension_numbers = #tpu.dot_dimension_numbers<[1], [0], [0], [1], [0, 0, 1, 1], [], []>} : vector<8x512xbf16>, vector<512x512xbf16>, vector<8x512xf32> -> vector<8x512xf32>
    %c0_9 = arith.constant 0 : index
    %c0_10 = arith.constant 0 : index
    %12 = vector.load %arg4[%c0_9, %c0_10] : memref<1x512xf32, #tpu.memory_space<vmem>>, vector<1x512xf32>
    %13 = vector.broadcast %12 : vector<1x512xf32> to vector<8x512xf32>
    %14 = arith.addf %11, %13 : vector<8x512xf32>
    %cst_11 = arith.constant 0.000000e+00 : f32
    %15 = vector.broadcast %cst_11 : f32 to vector<8x512xf32>
    %16 = arith.maximumf %14, %15 : vector<8x512xf32>
    %17 = arith.truncf %16 : vector<8x512xf32> to vector<8x512xbf16>
    %c0_12 = arith.constant 0 : index
    %c0_13 = arith.constant 0 : index
    %18 = vector.load %arg5[%c0_12, %c0_13] : memref<512x512xbf16, #tpu.memory_space<vmem>>, vector<512x512xbf16>
    %cst_14 = arith.constant dense<0.000000e+00> : vector<8x512xf32>
    %19 = tpu.matmul %17, %18, %cst_14 {dimension_numbers = #tpu.dot_dimension_numbers<[1], [0], [0], [1], [0, 0, 1, 1], [], []>} : vector<8x512xbf16>, vector<512x512xbf16>, vector<8x512xf32> -> vector<8x512xf32>
    %20 = tpu.iota {dimensions = array<i32: 0>} : vector<8x1xi32>
    %c6_i32 = arith.constant 6 : i32
    %21 = vector.broadcast %c6_i32 : i32 to vector<8x1xi32>
    %22 = arith.cmpi slt, %20, %21 : vector<8x1xi32>
    %cst_15 = arith.constant 0.000000e+00 : f32
    %23 = vector.shape_cast %22 : vector<8x1xi1> to vector<8x1xi1>
    %24 = vector.broadcast %23 : vector<8x1xi1> to vector<8x512xi1>
    %25 = vector.broadcast %cst_15 : f32 to vector<8x512xf32>
    %26 = arith.select %24, %19, %25 : vector<8x512xi1>, vector<8x512xf32>
    %cst_16 = arith.constant dense<0.000000e+00> : vector<512xf32>
    %27 = vector.multi_reduction <add>, %26, %cst_16 [0] : vector<8x512xf32> to vector<512xf32>
    %28 = vector.shape_cast %27 : vector<512xf32> to vector<1x512xf32>
    %cst_17 = arith.constant 0.166666672 : f32
    %29 = vector.broadcast %cst_17 : f32 to vector<1x512xf32>
    %30 = arith.mulf %28, %29 : vector<1x512xf32>
    %31 = vector.broadcast %30 : vector<1x512xf32> to vector<8x512xf32>
    %32 = arith.subf %19, %31 : vector<8x512xf32>
    %cst_18 = arith.constant 0.000000e+00 : f32
    %33 = vector.shape_cast %22 : vector<8x1xi1> to vector<8x1xi1>
    %34 = vector.broadcast %33 : vector<8x1xi1> to vector<8x512xi1>
    %35 = vector.broadcast %cst_18 : f32 to vector<8x512xf32>
    %36 = arith.select %34, %32, %35 : vector<8x512xi1>, vector<8x512xf32>
    %37 = arith.mulf %36, %36 : vector<8x512xf32>
    %cst_19 = arith.constant dense<0.000000e+00> : vector<512xf32>
    %38 = vector.multi_reduction <add>, %37, %cst_19 [0] : vector<8x512xf32> to vector<512xf32>
    %39 = vector.shape_cast %38 : vector<512xf32> to vector<1x512xf32>
    %cst_20 = arith.constant 0.166666672 : f32
    %40 = vector.broadcast %cst_20 : f32 to vector<1x512xf32>
    %41 = arith.mulf %39, %40 : vector<1x512xf32>
    %cst_21 = arith.constant 9.99999974E-6 : f32
    %42 = vector.broadcast %cst_21 : f32 to vector<1x512xf32>
    %43 = arith.addf %41, %42 : vector<1x512xf32>
    %44 = math.rsqrt %43 : vector<1x512xf32>
    %c0_22 = arith.constant 0 : index
    %c0_23 = arith.constant 0 : index
    %45 = vector.load %arg6[%c0_22, %c0_23] : memref<1x512xf32, #tpu.memory_space<vmem>>, vector<1x512xf32>
    %46 = arith.mulf %45, %44 : vector<1x512xf32>
    %c0_24 = arith.constant 0 : index
    %c0_25 = arith.constant 0 : index
    %47 = vector.load %arg7[%c0_24, %c0_25] : memref<1x512xf32, #tpu.memory_space<vmem>>, vector<1x512xf32>
    %48 = arith.mulf %30, %46 : vector<1x512xf32>
    %49 = arith.subf %47, %48 : vector<1x512xf32>
    %50 = vector.broadcast %46 : vector<1x512xf32> to vector<8x512xf32>
    %51 = arith.mulf %19, %50 : vector<8x512xf32>
    %52 = vector.broadcast %49 : vector<1x512xf32> to vector<8x512xf32>
    %53 = arith.addf %51, %52 : vector<8x512xf32>
    %c0_26 = arith.constant 0 : index
    %c0_27 = arith.constant 0 : index
    %54 = vector.load %arg8[%c0_26, %c0_27] : memref<8x512xf32, #tpu.memory_space<vmem>>, vector<8x512xf32>
    tpu.vector_store %arg8[%c0_26, %c0_27], %53 {strides = array<i32>} : memref<8x512xf32, #tpu.memory_space<vmem>>, vector<8x512xf32>,
    return
  }
}

</mosaic_0001>

<bundles_post_ra>
// kernel: tpu_custom_call.1
= control target key start
LH: loop header
LB: loop body
LE: loop exit
PB: predicated region body
PF: predicated region fallthrough
CT: control target
= control target key end

     0   :  { %13 = vsyncpa [#allocation3], 0  ;;  %s4531_s0 = inlined_call_operand.hbm [shape: f32[8,512], index: 0, kind: input, shape index: {}]   ;;  %s4532_s1 = inlined_call_operand.hbm [shape: bf16[512,512], index: 1, kind: input, shape index: {}]   ;;  %s4533_s2 = inlined_call_operand.vmem [shape: f32[1,512], index: 2, kind: input, shape index: {}]   ;;  %s4534_s3 = inlined_call_operand.hbm [shape: bf16[512,512], index: 3, kind: input, shape index: {}]   ;;  %s4535_s4 = inlined_call_operand.vmem [shape: f32[1,512], index: 4, kind: input, shape index: {}]   ;;  %s4536_s5 = inlined_call_operand.hbm [shape: bf16[512,512], index: 5, kind: input, shape index: {}]   ;;  %s4537_s6 = inlined_call_operand.vmem [shape: f32[1,512], index: 6, kind: input, shape index: {}]   ;;  %s4538_s7 = inlined_call_operand.vmem [shape: f32[1,512], index: 7, kind: input, shape index: {}]   ;;  %s4539_s8 = inlined_call_operand.hbm [shape: f32[8,512], index: 8, kind: output, shape index: {}]  }
   0x1   :  { %14 = vsyncpa [#allocation6], 0 }
   0x2   :  { %15 = vsyncpa [#allocation9], 0 }
   0x3   :  { %16 = vsyncpa [#allocation4], 0  ;;  %s4295_s27 = smov [#allocation5]   ;;  %s4177_s9 = scalar_lea.hbm %s4532_s1, 16384 }
   0x4   :  { %s32_s28 = sshll.u32 %s4295_s27, 4  ;;  %p4178_p0 = scmp.ne.s32.totalorder %s4532_s1, %s4177_s9  ;;  %s33_s28 = int_to_ptr.vmem [resolvable:$true] %s32_s28 }
   0x5   :  { %p4181_p1 = scmp.lt.u32.totalorder %s4177_s9, %s4532_s1 }
   0x7   :  { %p4183_p2 = pnand %p4181_p1, %p4178_p0 }
   0x9   :  { %4186 = shalt.err (!%p4183_p2)
}
   0xa   :  { %s4187_s14 = scalar_lea.vmem %s33_s28, 16384  ;;  %p4192_p4 = scmp.lt.s32.totalorder %s33_s28, %s33_s28 }
   0xb   :  { %p4188_p3 = scmp.ne.s32.totalorder %s33_s28, %s4187_s14  ;;  %p4193_p5 = scmp.lt.s32.totalorder %s4187_s14, %s4187_s14 }
   0xd   :  { %p4194_p6 = por %p4193_p5, %p4192_p4 }
   0xf   :  { %p4195_p7 = pnand %p4194_p6, %p4188_p3 }
  0x11   :  { %4198 = shalt.err (!%p4195_p7)
}
  0x12   :  { %s4296_s15 = smov 256   ;;  %s4297_s16 = smov 16  }
  0x13   :  { %38 = dma.hbm_to_vmem [thread:$0]  %s4532_s1, 16384, %s33_s28, [#allocation6], %s4296_s15, %s4296_s15, %s4297_s16  }
  0x14   :  { %s4298_s19 = smov [#allocation2]   ;;  %s4299_s21 = smov [#allocation7]  }
  0x15   :  { %s23_s20 = sshll.u32 %s4298_s19, 4  ;;  %s46_s22 = sshll.u32 %s4299_s21, 4  ;;  %s24_s20 = int_to_ptr.vmem [resolvable:$true] %s23_s20  ;;  %s47_s22 = int_to_ptr.vmem [resolvable:$true] %s46_s22 }
  0x16   :  { %s4199_s25 = scalar_lea.hbm %s4531_s0, 512 }
  0x17   :  { %p4200_p8 = scmp.ne.s32.totalorder %s4531_s0, %s4199_s25  ;;  %p4203_p9 = scmp.lt.u32.totalorder %s4199_s25, %s4531_s0 }
  0x19   :  { %p4205_p10 = pnand %p4203_p9, %p4200_p8 }
  0x1b   :  { %4208 = shalt.err (!%p4205_p10)
}
  0x1c   :  { %s4209_s1 = scalar_lea.vmem %s24_s20, 512  ;;  %p4214_p12 = scmp.lt.s32.totalorder %s24_s20, %s24_s20 }
  0x1d   :  { %p4210_p11 = scmp.ne.s32.totalorder %s24_s20, %s4209_s1  ;;  %p4215_p13 = scmp.lt.s32.totalorder %s4209_s1, %s4209_s1 }
  0x1f   :  { %p4216_p0 = por %p4215_p13, %p4214_p12 }
  0x21   :  { %p4217_p1 = pnand %p4216_p0, %p4210_p11 }
  0x23   :  { %4220 = shalt.err (!%p4217_p1)
}
  0x24   :  { %26 = dma.hbm_to_vmem [thread:$0]  %s4531_s0, 512, %s24_s20, [#allocation3]  }
  0x25   :  { %s4221_s12 = scalar_lea.hbm %s4534_s3, 16384 }
  0x26   :  { %p4222_p2 = scmp.ne.s32.totalorder %s4534_s3, %s4221_s12  ;;  %p4225_p3 = scmp.lt.u32.totalorder %s4221_s12, %s4534_s3 }
  0x28   :  { %p4227_p4 = pnand %p4225_p3, %p4222_p2 }
  0x2a   :  { %4230 = shalt.err (!%p4227_p4)
}
  0x2b   :  { %s4231_s19 = scalar_lea.vmem %s47_s22, 16384  ;;  %p4236_p6 = scmp.lt.s32.totalorder %s47_s22, %s47_s22 }
  0x2c   :  { %p4232_p5 = scmp.ne.s32.totalorder %s47_s22, %s4231_s19  ;;  %p4237_p7 = scmp.lt.s32.totalorder %s4231_s19, %s4231_s19 }
  0x2e   :  { %p4238_p8 = por %p4237_p7, %p4236_p6 }
  0x30   :  { %p4239_p9 = pnand %p4238_p8, %p4232_p5 }
  0x32   :  { %4242 = shalt.err (!%p4239_p9)
}
  0x33   :  { %52 = dma.hbm_to_vmem [thread:$0]  %s4534_s3, 16384, %s47_s22, [#allocation6], %s4296_s15, %s4296_s15, %s4297_s16  }
  0x34   :  { %s4300_s21 = smov [#allocation8]   ;;  %s4243_s26 = scalar_lea.hbm %s4536_s5, 16384 }
  0x35   :  { %s60_s23 = sshll.u32 %s4300_s21, 4  ;;  %p4244_p10 = scmp.ne.s32.totalorder %s4536_s5, %s4243_s26  ;;  %s61_s23 = int_to_ptr.vmem [resolvable:$true] %s60_s23 }
  0x36   :  { %p4247_p11 = scmp.lt.u32.totalorder %s4243_s26, %s4536_s5 }
  0x38   :  { %p4249_p12 = pnand %p4247_p11, %p4244_p10 }
  0x3a   :  { %4252 = shalt.err (!%p4249_p12)
}
  0x3b   :  { %s4253_s28 = scalar_lea.vmem %s61_s23, 16384  ;;  %p4258_p0 = scmp.lt.s32.totalorder %s61_s23, %s61_s23 }
  0x3c   :  { %p4254_p13 = scmp.ne.s32.totalorder %s61_s23, %s4253_s28  ;;  %p4259_p1 = scmp.lt.s32.totalorder %s4253_s28, %s4253_s28 }
  0x3e   :  { %p4260_p2 = por %p4259_p1, %p4258_p0 }
  0x40   :  { %p4261_p3 = pnand %p4260_p2, %p4254_p13 }
  0x42   :  { %4264 = shalt.err (!%p4261_p3)
}
  0x43   :  { %66 = dma.hbm_to_vmem [thread:$0]  %s4536_s5, 16384, %s61_s23, [#allocation9], %s4296_s15, %s4296_s15, %s4297_s16  }
  0x44   :  { %4287 = dma.done.wait [#allocation3], 512  }
  0x45   :  { %4288 = vsyncadd [#allocation3], 4294966784 }
  0x46   :  { %4289 = dma.done.wait [#allocation6], 32768  }
  0x47   :  { %4290 = vsyncadd [#allocation6], 4294934528 }
  0x48   :  { %4291 = dma.done.wait [#allocation9], 16384  }
  0x49   :  { %4292 = vsyncadd [#allocation9], 4294950912  ;;  %v3593_v0 = vld [vmem:[#allocation5 + $0x4] ss:$16 sps:$4 sm:$0xff]   ;;  %v3595_v1 = vld [vmem:[#allocation5 + $0xc] ss:$16 sps:$4 sm:$0xff]  }
  0x4a   :  { %881 = vmatprep.subr.bf16.mxu0 %v3593_v0  ;;  %v3597_v2 = vld [vmem:[#allocation5] ss:$16 sps:$4 sm:$0xff]   ;;  %v3598_v3 = vld [vmem:[#allocation5 + $0x8] ss:$16 sps:$4 sm:$0xff]   ;;  %963 = vmatprep.subr.bf16.mxu1 %v3595_v1  ;;  %v3599_v4 = vld [vmem:[#allocation5 + $0x24] ss:$16 sps:$4 sm:$0xff]  }
  0x4b   :  { %882 = vmatpush1.bf16.msra.mxu0 %v3597_v2  ;;  %964 = vmatpush1.bf16.msra.mxu1 %v3598_v3  ;;  %v3601_v5 = vld [vmem:[#allocation5 + $0x2c] ss:$16 sps:$4 sm:$0xff]   ;;  %v3603_v6 = vld [vmem:[#allocation5 + $0x20] ss:$16 sps:$4 sm:$0xff]   ;;  %v3604_v7 = vld [vmem:[#allocation5 + $0x28] ss:$16 sps:$4 sm:$0xff]  }
  0x4c   :  { %883 = vmatprep.subr.bf16.mxu0 %v3599_v4  ;;  %965 = vmatprep.subr.bf16.mxu1 %v3601_v5  ;;  %v3605_v8 = vld [vmem:[#allocation5 + $0x44] ss:$16 sps:$4 sm:$0xff]   ;;  %v3607_v9 = vld [vmem:[#allocation5 + $0x4c] ss:$16 sps:$4 sm:$0xff]   ;;  %v3609_v10 = vld [vmem:[#allocation5 + $0x40] ss:$16 sps:$4 sm:$0xff]  }
  0x4d   :  { %v3610_v11 = vld [vmem:[#allocation5 + $0x48] ss:$16 sps:$4 sm:$0xff]   ;;  %v3611_v12 = vld [vmem:[#allocation5 + $0x64] ss:$16 sps:$4 sm:$0xff]   ;;  %v3613_v13 = vld [vmem:[#allocation5 + $0x6c] ss:$16 sps:$4 sm:$0xff]  }
  0x4e   :  { %v3615_v14 = vld [vmem:[#allocation5 + $0x60] ss:$16 sps:$4 sm:$0xff]   ;;  %v3616_v15 = vld [vmem:[#allocation5 + $0x68] ss:$16 sps:$4 sm:$0xff]   ;;  %v3617_v16 = vld [vmem:[#allocation5 + $0x84] ss:$16 sps:$4 sm:$0xff]  }
  0x4f   :  { %884 = vmatpush1.bf16.msra.mxu0 %v3603_v6  ;;  %966 = vmatpush1.bf16.msra.mxu1 %v3604_v7  ;;  %v3619_v17 = vld [vmem:[#allocation5 + $0x8c] ss:$16 sps:$4 sm:$0xff]   ;;  %v3621_v18 = vld [vmem:[#allocation5 + $0x80] ss:$16 sps:$4 sm:$0xff]   ;;  %v3622_v19 = vld [vmem:[#allocation5 + $0x88] ss:$16 sps:$4 sm:$0xff]  }
  0x50   :  { %885 = vmatprep.subr.bf16.mxu0 %v3605_v8  ;;  %967 = vmatprep.subr.bf16.mxu1 %v3607_v9  ;;  %v3623_v20 = vld [vmem:[#allocation5 + $0xa4] ss:$16 sps:$4 sm:$0xff]   ;;  %v3625_v21 = vld [vmem:[#allocation5 + $0xac] ss:$16 sps:$4 sm:$0xff]   ;;  %v3627_v22 = vld [vmem:[#allocation5 + $0xa0] ss:$16 sps:$4 sm:$0xff]  }
  0x51   :  { %v3628_v23 = vld [vmem:[#allocation5 + $0xa8] ss:$16 sps:$4 sm:$0xff]   ;;  %v3629_v24 = vld [vmem:[#allocation5 + $0xc4] ss:$16 sps:$4 sm:$0xff]   ;;  %v3631_v25 = vld [vmem:[#allocation5 + $0xcc] ss:$16 sps:$4 sm:$0xff]  }
  0x52   :  { %v3633_v26 = vld [vmem:[#allocation5 + $0xc0] ss:$16 sps:$4 sm:$0xff]   ;;  %v3634_v27 = vld [vmem:[#allocation5 + $0xc8] ss:$16 sps:$4 sm:$0xff]   ;;  %v3635_v28 = vld [vmem:[#allocation5 + $0xe4] ss:$16 sps:$4 sm:$0xff]  }
  0x53   :  { %886 = vmatpush1.bf16.msra.mxu0 %v3609_v10  ;;  %968 = vmatpush1.bf16.msra.mxu1 %v3610_v11  ;;  %v3637_v29 = vld [vmem:[#allocation5 + $0xec] ss:$16 sps:$4 sm:$0xff]   ;;  %v3639_v30 = vld [vmem:[#allocation5 + $0xe0] ss:$16 sps:$4 sm:$0xff]   ;;  %v3640_v31 = vld [vmem:[#allocation5 + $0xe8] ss:$16 sps:$4 sm:$0xff]  }
  0x54   :  { %887 = vmatprep.subr.bf16.mxu0 %v3611_v12  ;;  %969 = vmatprep.subr.bf16.mxu1 %v3613_v13  ;;  %v3641_v32 = vld [vmem:[#allocation5 + $0x104] ss:$16 sps:$4 sm:$0xff]   ;;  %v3643_v33 = vld [vmem:[#allocation5 + $0x10c] ss:$16 sps:$4 sm:$0xff]   ;;  %v3645_v34 = vld [vmem:[#allocation5 + $0x100] ss:$16 sps:$4 sm:$0xff]  }
  0x55   :  { %v3646_v35 = vld [vmem:[#allocation5 + $0x108] ss:$16 sps:$4 sm:$0xff]   ;;  %v3647_v36 = vld [vmem:[#allocation5 + $0x124] ss:$16 sps:$4 sm:$0xff]   ;;  %v3649_v37 = vld [vmem:[#allocation5 + $0x12c] ss:$16 sps:$4 sm:$0xff]  }
  0x56   :  { %v3651_v38 = vld [vmem:[#allocation5 + $0x120] ss:$16 sps:$4 sm:$0xff]   ;;  %v3652_v39 = vld [vmem:[#allocation5 + $0x128] ss:$16 sps:$4 sm:$0xff]   ;;  %v3653_v40 = vld [vmem:[#allocation5 + $0x144] ss:$16 sps:$4 sm:$0xff]  }
  0x57   :  { %888 = vmatpush1.bf16.msra.mxu0 %v3615_v14  ;;  %970 = vmatpush1.bf16.msra.mxu1 %v3616_v15  ;;  %v3655_v41 = vld [vmem:[#allocation5 + $0x14c] ss:$16 sps:$4 sm:$0xff]   ;;  %v3657_v42 = vld [vmem:[#allocation5 + $0x140] ss:$16 sps:$4 sm:$0xff]   ;;  %v3658_v43 = vld [vmem:[#allocation5 + $0x148] ss:$16 sps:$4 sm:$0xff]  }
  0x58   :  { %889 = vmatprep.subr.bf16.mxu0 %v3617_v16  ;;  %971 = vmatprep.subr.bf16.mxu1 %v3619_v17  ;;  %v3659_v44 = vld [vmem:[#allocation5 + $0x164] ss:$16 sps:$4 sm:$0xff]   ;;  %v3661_v45 = vld [vmem:[#allocation5 + $0x16c] ss:$16 sps:$4 sm:$0xff]   ;;  %v3663_v47 = vld [vmem:[#allocation5 + $0x160] ss:$16 sps:$4 sm:$0xff]  }
  0x59   :  { %v84_v46 = vld [vmem:[#allocation2 + $0x8] sm:$0xff]  ;;  %v3665_v50 = vld [vmem:[#allocation5 + $0x184] ss:$16 sps:$4 sm:$0xff]   ;;  %v3669_v52 = vld [vmem:[#allocation5 + $0x180] ss:$16 sps:$4 sm:$0xff]   ;;  %s4302_s11 = smov [#allocation10]  }
  0x5a   :  { %v88_v48 = vpack.c.bf16 %v84_v46, %v84_v46  ;;  %v3664_v49 = vld [vmem:[#allocation5 + $0x168] ss:$16 sps:$4 sm:$0xff]   ;;  %v3667_v51 = vld [vmem:[#allocation5 + $0x18c] ss:$16 sps:$4 sm:$0xff]   ;;  %v3671_v54 = vld [vmem:[#allocation5 + $0x1a4] ss:$16 sps:$4 sm:$0xff]  }
  0x5b   :  { %890 = vmatpush1.bf16.msra.mxu0 %v3621_v18  ;;  %972 = vmatpush1.bf16.msra.mxu1 %v3622_v19  ;;  %v3670_v53 = vld [vmem:[#allocation5 + $0x188] ss:$16 sps:$4 sm:$0xff]   ;;  %v3673_v55 = vld [vmem:[#allocation5 + $0x1ac] ss:$16 sps:$4 sm:$0xff]   ;;  %v3675_v56 = vld [vmem:[#allocation5 + $0x1a0] ss:$16 sps:$4 sm:$0xff]  }
  0x5c   :  { %891 = vmatprep.subr.bf16.mxu0 %v3623_v20  ;;  %973 = vmatprep.subr.bf16.mxu1 %v3625_v21  ;;  %v3676_v57 = vld [vmem:[#allocation5 + $0x1a8] ss:$16 sps:$4 sm:$0xff]   ;;  %v3677_v58 = vld [vmem:[#allocation5 + $0x1c4] ss:$16 sps:$4 sm:$0xff]   ;;  %v3679_v59 = vld [vmem:[#allocation5 + $0x1cc] ss:$16 sps:$4 sm:$0xff]  }
  0x5d   :  { %913 = vmatprep.mubr.bf16.mxu0 %v88_v48  ;;  %995 = vmatprep.mubr.bf16.mxu1 %v88_v48  ;;  %v3681_v60 = vld [vmem:[#allocation5 + $0x1c0] ss:$16 sps:$4 sm:$0xff]   ;;  %v3682_v61 = vld [vmem:[#allocation5 + $0x1c8] ss:$16 sps:$4 sm:$0xff]   ;;  %v3683_v62 = vld [vmem:[#allocation5 + $0x1e4] ss:$16 sps:$4 sm:$0xff]  }
  0x5e   :  { %v3685_v63 = vld [vmem:[#allocation5 + $0x1ec] ss:$16 sps:$4 sm:$0xff]   ;;  %v3687_v0 = vld [vmem:[#allocation5 + $0x1e0] ss:$16 sps:$4 sm:$0xff]   ;;  %v3688_v1 = vld [vmem:[#allocation5 + $0x1e8] ss:$16 sps:$4 sm:$0xff]  }
  0x5f   :  { %892 = vmatpush1.bf16.msra.mxu0 %v3627_v22  ;;  %974 = vmatpush1.bf16.msra.mxu1 %v3628_v23  ;;  %v83_v2 = vld [vmem:[#allocation2] sm:$0xff]  ;;  %v3694_v4 = vld [vmem:[#allocation5 + $0x20c] ss:$16 sps:$4 sm:$0xff]   ;;  %v3692_v7 = vld [vmem:[#allocation5 + $0x208] ss:$16 sps:$4 sm:$0xff]   ;;  %s3158_s12 = sshll.u32 %s4302_s11, 4  ;;  %s3159_s12 = int_to_ptr.vmem [resolvable:$true] %s3158_s12 }
  0x60   :  { %893 = vmatprep.subr.bf16.mxu0 %v3629_v24  ;;  %975 = vmatprep.subr.bf16.mxu1 %v3631_v25  ;;  %v3691_v3 = vld [vmem:[#allocation5 + $0x204] ss:$16 sps:$4 sm:$0xff]   ;;  %v87_v5 = vpack.c.bf16 %v83_v2, %v83_v2  ;;  %v3689_v6 = vld [vmem:[#allocation5 + $0x200] ss:$16 sps:$4 sm:$0xff]   ;;  %v3700_v9 = vld [vmem:[#allocation5 + $0x22c] ss:$16 sps:$4 sm:$0xff]   ;;  %p4270_p5 = scmp.lt.s32.totalorder %s3159_s12, %s3159_s12 }
  0x61   :  { %v3697_v8 = vld [vmem:[#allocation5 + $0x224] ss:$16 sps:$4 sm:$0xff]   ;;  %v3695_v10 = vld [vmem:[#allocation5 + $0x220] ss:$16 sps:$4 sm:$0xff]   ;;  %v3698_v11 = vld [vmem:[#allocation5 + $0x228] ss:$16 sps:$4 sm:$0xff]  }
  0x62   :  { %v3703_v12 = vld [vmem:[#allocation5 + $0x244] ss:$16 sps:$4 sm:$0xff]   ;;  %v3706_v13 = vld [vmem:[#allocation5 + $0x24c] ss:$16 sps:$4 sm:$0xff]   ;;  %v3701_v14 = vld [vmem:[#allocation5 + $0x240] ss:$16 sps:$4 sm:$0xff]  }
  0x63   :  { %894 = vmatpush1.bf16.msra.mxu0 %v3633_v26  ;;  %976 = vmatpush1.bf16.msra.mxu1 %v3634_v27  ;;  %v3704_v15 = vld [vmem:[#allocation5 + $0x248] ss:$16 sps:$4 sm:$0xff]   ;;  %v3709_v16 = vld [vmem:[#allocation5 + $0x264] ss:$16 sps:$4 sm:$0xff]   ;;  %v3712_v17 = vld [vmem:[#allocation5 + $0x26c] ss:$16 sps:$4 sm:$0xff]  }
  0x64   :  { %895 = vmatprep.subr.bf16.mxu0 %v3635_v28  ;;  %977 = vmatprep.subr.bf16.mxu1 %v3637_v29  ;;  %v3707_v18 = vld [vmem:[#allocation5 + $0x260] ss:$16 sps:$4 sm:$0xff]   ;;  %v3710_v19 = vld [vmem:[#allocation5 + $0x268] ss:$16 sps:$4 sm:$0xff]   ;;  %v3715_v20 = vld [vmem:[#allocation5 + $0x284] ss:$16 sps:$4 sm:$0xff]  }
  0x65   :  { %v3718_v21 = vld [vmem:[#allocation5 + $0x28c] ss:$16 sps:$4 sm:$0xff]   ;;  %v3713_v22 = vld [vmem:[#allocation5 + $0x280] ss:$16 sps:$4 sm:$0xff]   ;;  %v3716_v23 = vld [vmem:[#allocation5 + $0x288] ss:$16 sps:$4 sm:$0xff]  }
  0x66   :  { %v3721_v24 = vld [vmem:[#allocation5 + $0x2a4] ss:$16 sps:$4 sm:$0xff]   ;;  %v3724_v25 = vld [vmem:[#allocation5 + $0x2ac] ss:$16 sps:$4 sm:$0xff]   ;;  %v3719_v26 = vld [vmem:[#allocation5 + $0x2a0] ss:$16 sps:$4 sm:$0xff]  }
  0x67   :  { %896 = vmatpush1.bf16.msra.mxu0 %v3639_v30  ;;  %978 = vmatpush1.bf16.msra.mxu1 %v3640_v31  ;;  %v3722_v27 = vld [vmem:[#allocation5 + $0x2a8] ss:$16 sps:$4 sm:$0xff]   ;;  %v3727_v28 = vld [vmem:[#allocation5 + $0x2c4] ss:$16 sps:$4 sm:$0xff]   ;;  %v3730_v29 = vld [vmem:[#allocation5 + $0x2cc] ss:$16 sps:$4 sm:$0xff]  }
  0x68   :  { %897 = vmatprep.subr.bf16.mxu0 %v3641_v32  ;;  %979 = vmatprep.subr.bf16.mxu1 %v3643_v33  ;;  %v86_v30 = vld [vmem:[#allocation2 + $0x18] sm:$0xff]  ;;  %v3725_v31 = vld [vmem:[#allocation5 + $0x2c0] ss:$16 sps:$4 sm:$0xff]   ;;  %v3751_v46 = vld [vmem:[#allocation5 + $0x344] ss:$16 sps:$4 sm:$0xff]  }
  0x69   :  { %v3728_v32 = vld [vmem:[#allocation5 + $0x2c8] ss:$16 sps:$4 sm:$0xff]   ;;  %v90_v33 = vpack.c.bf16 %v86_v30, %v86_v30  ;;  %v3749_v48 = vld [vmem:[#allocation5 + $0x340] ss:$16 sps:$4 sm:$0xff]   ;;  %v3781_v2 = vld [vmem:[#allocation5 + $0x3e4] ss:$16 sps:$4 sm:$0xff]  }
  0x6a   :  { %v3815_v30 = vld [vmem:[#allocation7 + $0xa0] ss:$16 sps:$4 sm:$0xff]  }
  0x6b   :  { %898 = vmatpush1.bf16.msra.mxu0 %v3645_v34  ;;  %980 = vmatpush1.bf16.msra.mxu1 %v3646_v35  ;;  %v3733_v34 = vld [vmem:[#allocation5 + $0x2e4] ss:$16 sps:$4 sm:$0xff]   ;;  %v3736_v35 = vld [vmem:[#allocation5 + $0x2ec] ss:$16 sps:$4 sm:$0xff]  }
  0x6c   :  { %899 = vmatprep.subr.bf16.mxu0 %v3647_v36  ;;  %981 = vmatprep.subr.bf16.mxu1 %v3649_v37  ;;  %v3731_v36 = vld [vmem:[#allocation5 + $0x2e0] ss:$16 sps:$4 sm:$0xff]   ;;  %v3734_v37 = vld [vmem:[#allocation5 + $0x2e8] ss:$16 sps:$4 sm:$0xff]  }
  0x6f   :  { %900 = vmatpush1.bf16.msra.mxu0 %v3651_v38  ;;  %982 = vmatpush1.bf16.msra.mxu1 %v3652_v39  ;;  %v3739_v38 = vld [vmem:[#allocation5 + $0x304] ss:$16 sps:$4 sm:$0xff]   ;;  %v3742_v39 = vld [vmem:[#allocation5 + $0x30c] ss:$16 sps:$4 sm:$0xff]  }
  0x70   :  { %901 = vmatprep.subr.bf16.mxu0 %v3653_v40  ;;  %983 = vmatprep.subr.bf16.mxu1 %v3655_v41  ;;  %v3737_v40 = vld [vmem:[#allocation5 + $0x300] ss:$16 sps:$4 sm:$0xff]   ;;  %v3740_v41 = vld [vmem:[#allocation5 + $0x308] ss:$16 sps:$4 sm:$0xff]  }
  0x73   :  { %902 = vmatpush1.bf16.msra.mxu0 %v3657_v42  ;;  %984 = vmatpush1.bf16.msra.mxu1 %v3658_v43  ;;  %v3745_v42 = vld [vmem:[#allocation5 + $0x324] ss:$16 sps:$4 sm:$0xff]   ;;  %v3748_v43 = vld [vmem:[#allocation5 + $0x32c] ss:$16 sps:$4 sm:$0xff]  }
  0x74   :  { %903 = vmatprep.subr.bf16.mxu0 %v3659_v44  ;;  %985 = vmatprep.subr.bf16.mxu1 %v3661_v45  ;;  %v3743_v44 = vld [vmem:[#allocation5 + $0x320] ss:$16 sps:$4 sm:$0xff]   ;;  %v3746_v45 = vld [vmem:[#allocation5 + $0x328] ss:$16 sps:$4 sm:$0xff]  }
  0x77   :  { %904 = vmatpush1.bf16.msra.mxu0 %v3663_v47  ;;  %986 = vmatpush1.bf16.msra.mxu1 %v3664_v49  ;;  %v3754_v47 = vld [vmem:[#allocation5 + $0x34c] ss:$16 sps:$4 sm:$0xff]   ;;  %v3752_v49 = vld [vmem:[#allocation5 + $0x348] ss:$16 sps:$4 sm:$0xff]  }
  0x78   :  { %905 = vmatprep.subr.bf16.mxu0 %v3665_v50  ;;  %987 = vmatprep.subr.bf16.mxu1 %v3667_v51  ;;  %v3757_v50 = vld [vmem:[#allocation5 + $0x364] ss:$16 sps:$4 sm:$0xff]   ;;  %v3760_v51 = vld [vmem:[#allocation5 + $0x36c] ss:$16 sps:$4 sm:$0xff]  }
  0x7b   :  { %906 = vmatpush1.bf16.msra.mxu0 %v3669_v52  ;;  %988 = vmatpush1.bf16.msra.mxu1 %v3670_v53  ;;  %v3755_v52 = vld [vmem:[#allocation5 + $0x360] ss:$16 sps:$4 sm:$0xff]   ;;  %v3758_v53 = vld [vmem:[#allocation5 + $0x368] ss:$16 sps:$4 sm:$0xff]  }
  0x7c   :  { %907 = vmatprep.subr.bf16.mxu0 %v3671_v54  ;;  %989 = vmatprep.subr.bf16.mxu1 %v3673_v55  ;;  %v3763_v54 = vld [vmem:[#allocation5 + $0x384] ss:$16 sps:$4 sm:$0xff]   ;;  %v3766_v55 = vld [vmem:[#allocation5 + $0x38c] ss:$16 sps:$4 sm:$0xff]  }
  0x7f   :  { %908 = vmatpush1.bf16.msra.mxu0 %v3675_v56  ;;  %990 = vmatpush1.bf16.msra.mxu1 %v3676_v57  ;;  %v3761_v56 = vld [vmem:[#allocation5 + $0x380] ss:$16 sps:$4 sm:$0xff]   ;;  %v3764_v57 = vld [vmem:[#allocation5 + $0x388] ss:$16 sps:$4 sm:$0xff]  }
  0x80   :  { %909 = vmatprep.subr.bf16.mxu0 %v3677_v58  ;;  %991 = vmatprep.subr.bf16.mxu1 %v3679_v59  ;;  %v3769_v58 = vld [vmem:[#allocation5 + $0x3a4] ss:$16 sps:$4 sm:$0xff]   ;;  %v3772_v59 = vld [vmem:[#allocation5 + $0x3ac] ss:$16 sps:$4 sm:$0xff]  }
  0x83   :  { %910 = vmatpush1.bf16.msra.mxu0 %v3681_v60  ;;  %992 = vmatpush1.bf16.msra.mxu1 %v3682_v61  ;;  %v3767_v60 = vld [vmem:[#allocation5 + $0x3a0] ss:$16 sps:$4 sm:$0xff]   ;;  %v3770_v61 = vld [vmem:[#allocation5 + $0x3a8] ss:$16 sps:$4 sm:$0xff]  }
  0x84   :  { %911 = vmatprep.subr.bf16.mxu0 %v3683_v62  ;;  %993 = vmatprep.subr.bf16.mxu1 %v3685_v63  ;;  %v3775_v62 = vld [vmem:[#allocation5 + $0x3c4] ss:$16 sps:$4 sm:$0xff]   ;;  %v3778_v63 = vld [vmem:[#allocation5 + $0x3cc] ss:$16 sps:$4 sm:$0xff]  }
  0x87   :  { %912 = vmatpush1.bf16.msra.mxu0 %v3687_v0  ;;  %994 = vmatpush1.bf16.msra.mxu1 %v3688_v1  ;;  %v3773_v0 = vld [vmem:[#allocation5 + $0x3c0] ss:$16 sps:$4 sm:$0xff]   ;;  %v3776_v1 = vld [vmem:[#allocation5 + $0x3c8] ss:$16 sps:$4 sm:$0xff]  }
  0x88   :  { %922 = vmatprep.subr.bf16.mxu0 %v3691_v3  ;;  %1004 = vmatprep.subr.bf16.mxu1 %v3694_v4  ;;  %v3784_v3 = vld [vmem:[#allocation5 + $0x3ec] ss:$16 sps:$4 sm:$0xff]   ;;  %v3779_v4 = vld [vmem:[#allocation5 + $0x3e0] ss:$16 sps:$4 sm:$0xff]  }
  0x8a   :  { %914 = vmatmul.mubr.bf16.vlgmr.msra.gmra.mrb[0].mxu0 %v87_v5  ;;  %996 = vmatmul.mubr.bf16.vlgmr.msra.gmra.mrb[0].mxu1 %v87_v5  ;;  %v3782_v5 = vld [vmem:[#allocation5 + $0x3e8] ss:$16 sps:$4 sm:$0xff]  }
  0x8b   :  { %923 = vmatpush1.bf16.msra.mxu0 %v3689_v6  ;;  %1005 = vmatpush1.bf16.msra.mxu1 %v3692_v7  ;;  %v85_v6 = vld [vmem:[#allocation2 + $0x10] sm:$0xff] }
  0x8c   :  { %924 = vmatprep.subr.bf16.mxu0 %v3697_v8  ;;  %1006 = vmatprep.subr.bf16.mxu1 %v3700_v9  ;;  %v3787_v7 = vld [vmem:[#allocation7 + $0x4] ss:$16 sps:$4 sm:$0xff]   ;;  %v3790_v8 = vld [vmem:[#allocation7 + $0xc] ss:$16 sps:$4 sm:$0xff]   ;;  %v3785_v9 = vld [vmem:[#allocation7] ss:$16 sps:$4 sm:$0xff]  }
  0x8d   :  { %954 = vmatprep.mubr.bf16.mxu0 %v90_v33  ;;  %1036 = vmatprep.mubr.bf16.mxu1 %v90_v33  ;;  %v3826_v33 = vld [vmem:[#allocation7 + $0xcc] ss:$16 sps:$4 sm:$0xff]  }
  0x8f   :  { %925 = vmatpush1.bf16.msra.mxu0 %v3695_v10  ;;  %1007 = vmatpush1.bf16.msra.mxu1 %v3698_v11  ;;  %v3788_v10 = vld [vmem:[#allocation7 + $0x8] ss:$16 sps:$4 sm:$0xff]   ;;  %v89_v11 = vpack.c.bf16 %v85_v6, %v85_v6  ;;  %v3875_v6 = vld [vmem:[#allocation7 + $0x1e0] ss:$16 sps:$4 sm:$0xff]  }
  0x90   :  { %926 = vmatprep.subr.bf16.mxu0 %v3703_v12  ;;  %1008 = vmatprep.subr.bf16.mxu1 %v3706_v13  ;;  %v3793_v12 = vld [vmem:[#allocation7 + $0x24] ss:$16 sps:$4 sm:$0xff]   ;;  %v3796_v13 = vld [vmem:[#allocation7 + $0x2c] ss:$16 sps:$4 sm:$0xff]  }
  0x93   :  { %927 = vmatpush1.bf16.msra.mxu0 %v3701_v14  ;;  %1009 = vmatpush1.bf16.msra.mxu1 %v3704_v15  ;;  %v3791_v14 = vld [vmem:[#allocation7 + $0x20] ss:$16 sps:$4 sm:$0xff]   ;;  %v3794_v15 = vld [vmem:[#allocation7 + $0x28] ss:$16 sps:$4 sm:$0xff]  }
  0x94   :  { %928 = vmatprep.subr.bf16.mxu0 %v3709_v16  ;;  %1010 = vmatprep.subr.bf16.mxu1 %v3712_v17  ;;  %v3799_v16 = vld [vmem:[#allocation7 + $0x44] ss:$16 sps:$4 sm:$0xff]   ;;  %v3802_v17 = vld [vmem:[#allocation7 + $0x4c] ss:$16 sps:$4 sm:$0xff]  }
  0x97   :  { %929 = vmatpush1.bf16.msra.mxu0 %v3707_v18  ;;  %1011 = vmatpush1.bf16.msra.mxu1 %v3710_v19  ;;  %v3797_v18 = vld [vmem:[#allocation7 + $0x40] ss:$16 sps:$4 sm:$0xff]   ;;  %v3800_v19 = vld [vmem:[#allocation7 + $0x48] ss:$16 sps:$4 sm:$0xff]  }
  0x98   :  { %930 = vmatprep.subr.bf16.mxu0 %v3715_v20  ;;  %1012 = vmatprep.subr.bf16.mxu1 %v3718_v21  ;;  %v3805_v20 = vld [vmem:[#allocation7 + $0x64] ss:$16 sps:$4 sm:$0xff]   ;;  %v3808_v21 = vld [vmem:[#allocation7 + $0x6c] ss:$16 sps:$4 sm:$0xff]  }
  0x9b   :  { %931 = vmatpush1.bf16.msra.mxu0 %v3713_v22  ;;  %1013 = vmatpush1.bf16.msra.mxu1 %v3716_v23  ;;  %v3803_v22 = vld [vmem:[#allocation7 + $0x60] ss:$16 sps:$4 sm:$0xff]   ;;  %v3806_v23 = vld [vmem:[#allocation7 + $0x68] ss:$16 sps:$4 sm:$0xff]  }
  0x9c   :  { %932 = vmatprep.subr.bf16.mxu0 %v3721_v24  ;;  %1014 = vmatprep.subr.bf16.mxu1 %v3724_v25  ;;  %v3811_v24 = vld [vmem:[#allocation7 + $0x84] ss:$16 sps:$4 sm:$0xff]   ;;  %v3814_v25 = vld [vmem:[#allocation7 + $0x8c] ss:$16 sps:$4 sm:$0xff]  }
  0x9f   :  { %933 = vmatpush1.bf16.msra.mxu0 %v3719_v26  ;;  %1015 = vmatpush1.bf16.msra.mxu1 %v3722_v27  ;;  %v3809_v26 = vld [vmem:[#allocation7 + $0x80] ss:$16 sps:$4 sm:$0xff]   ;;  %v3812_v27 = vld [vmem:[#allocation7 + $0x88] ss:$16 sps:$4 sm:$0xff]  }
  0xa0   :  { %934 = vmatprep.subr.bf16.mxu0 %v3727_v28  ;;  %1016 = vmatprep.subr.bf16.mxu1 %v3730_v29  ;;  %v3817_v28 = vld [vmem:[#allocation7 + $0xa4] ss:$16 sps:$4 sm:$0xff]   ;;  %v3820_v29 = vld [vmem:[#allocation7 + $0xac] ss:$16 sps:$4 sm:$0xff]  }
  0xa3   :  { %935 = vmatpush1.bf16.msra.mxu0 %v3725_v31  ;;  %1017 = vmatpush1.bf16.msra.mxu1 %v3728_v32  ;;  %v3818_v31 = vld [vmem:[#allocation7 + $0xa8] ss:$16 sps:$4 sm:$0xff]   ;;  %v3823_v32 = vld [vmem:[#allocation7 + $0xc4] ss:$16 sps:$4 sm:$0xff]  }
  0xa4   :  { %936 = vmatprep.subr.bf16.mxu0 %v3733_v34  ;;  %1018 = vmatprep.subr.bf16.mxu1 %v3736_v35  ;;  %v3821_v34 = vld [vmem:[#allocation7 + $0xc0] ss:$16 sps:$4 sm:$0xff]   ;;  %v3824_v35 = vld [vmem:[#allocation7 + $0xc8] ss:$16 sps:$4 sm:$0xff]  }
  0xa7   :  { %937 = vmatpush1.bf16.msra.mxu0 %v3731_v36  ;;  %1019 = vmatpush1.bf16.msra.mxu1 %v3734_v37  ;;  %v3829_v36 = vld [vmem:[#allocation7 + $0xe4] ss:$16 sps:$4 sm:$0xff]   ;;  %v3832_v37 = vld [vmem:[#allocation7 + $0xec] ss:$16 sps:$4 sm:$0xff]  }
  0xa8   :  { %938 = vmatprep.subr.bf16.mxu0 %v3739_v38  ;;  %1020 = vmatprep.subr.bf16.mxu1 %v3742_v39  ;;  %v3827_v38 = vld [vmem:[#allocation7 + $0xe0] ss:$16 sps:$4 sm:$0xff]   ;;  %v3830_v39 = vld [vmem:[#allocation7 + $0xe8] ss:$16 sps:$4 sm:$0xff]  }
  0xab   :  { %939 = vmatpush1.bf16.msra.mxu0 %v3737_v40  ;;  %1021 = vmatpush1.bf16.msra.mxu1 %v3740_v41  ;;  %v3835_v40 = vld [vmem:[#allocation7 + $0x104] ss:$16 sps:$4 sm:$0xff]   ;;  %v3838_v41 = vld [vmem:[#allocation7 + $0x10c] ss:$16 sps:$4 sm:$0xff]  }
  0xac   :  { %940 = vmatprep.subr.bf16.mxu0 %v3745_v42  ;;  %1022 = vmatprep.subr.bf16.mxu1 %v3748_v43  ;;  %v3833_v42 = vld [vmem:[#allocation7 + $0x100] ss:$16 sps:$4 sm:$0xff]   ;;  %v3836_v43 = vld [vmem:[#allocation7 + $0x108] ss:$16 sps:$4 sm:$0xff]  }
  0xaf   :  { %941 = vmatpush1.bf16.msra.mxu0 %v3743_v44  ;;  %1023 = vmatpush1.bf16.msra.mxu1 %v3746_v45  ;;  %v3841_v44 = vld [vmem:[#allocation7 + $0x124] ss:$16 sps:$4 sm:$0xff]   ;;  %v3844_v45 = vld [vmem:[#allocation7 + $0x12c] ss:$16 sps:$4 sm:$0xff]  }
  0xb0   :  { %942 = vmatprep.subr.bf16.mxu0 %v3751_v46  ;;  %1024 = vmatprep.subr.bf16.mxu1 %v3754_v47  ;;  %v3839_v46 = vld [vmem:[#allocation7 + $0x120] ss:$16 sps:$4 sm:$0xff]   ;;  %v3842_v47 = vld [vmem:[#allocation7 + $0x128] ss:$16 sps:$4 sm:$0xff]  }
  0xb3   :  { %943 = vmatpush1.bf16.msra.mxu0 %v3749_v48  ;;  %1025 = vmatpush1.bf16.msra.mxu1 %v3752_v49  ;;  %v3847_v48 = vld [vmem:[#allocation7 + $0x144] ss:$16 sps:$4 sm:$0xff]   ;;  %v3850_v49 = vld [vmem:[#allocation7 + $0x14c] ss:$16 sps:$4 sm:$0xff]  }
  0xb4   :  { %944 = vmatprep.subr.bf16.mxu0 %v3757_v50  ;;  %1026 = vmatprep.subr.bf16.mxu1 %v3760_v51  ;;  %v3845_v50 = vld [vmem:[#allocation7 + $0x140] ss:$16 sps:$4 sm:$0xff]   ;;  %v3848_v51 = vld [vmem:[#allocation7 + $0x148] ss:$16 sps:$4 sm:$0xff]  }
  0xb7   :  { %945 = vmatpush1.bf16.msra.mxu0 %v3755_v52  ;;  %1027 = vmatpush1.bf16.msra.mxu1 %v3758_v53  ;;  %v3853_v52 = vld [vmem:[#allocation7 + $0x164] ss:$16 sps:$4 sm:$0xff]   ;;  %v3856_v53 = vld [vmem:[#allocation7 + $0x16c] ss:$16 sps:$4 sm:$0xff]  }
  0xb8   :  { %946 = vmatprep.subr.bf16.mxu0 %v3763_v54  ;;  %1028 = vmatprep.subr.bf16.mxu1 %v3766_v55  ;;  %v3851_v54 = vld [vmem:[#allocation7 + $0x160] ss:$16 sps:$4 sm:$0xff]   ;;  %v3854_v55 = vld [vmem:[#allocation7 + $0x168] ss:$16 sps:$4 sm:$0xff]  }
  0xbb   :  { %947 = vmatpush1.bf16.msra.mxu0 %v3761_v56  ;;  %1029 = vmatpush1.bf16.msra.mxu1 %v3764_v57  ;;  %v3859_v56 = vld [vmem:[#allocation7 + $0x184] ss:$16 sps:$4 sm:$0xff]   ;;  %v3862_v57 = vld [vmem:[#allocation7 + $0x18c] ss:$16 sps:$4 sm:$0xff]  }
  0xbc   :  { %948 = vmatprep.subr.bf16.mxu0 %v3769_v58  ;;  %1030 = vmatprep.subr.bf16.mxu1 %v3772_v59  ;;  %v3857_v58 = vld [vmem:[#allocation7 + $0x180] ss:$16 sps:$4 sm:$0xff]   ;;  %v3860_v59 = vld [vmem:[#allocation7 + $0x188] ss:$16 sps:$4 sm:$0xff]  }
  0xbf   :  { %949 = vmatpush1.bf16.msra.mxu0 %v3767_v60  ;;  %1031 = vmatpush1.bf16.msra.mxu1 %v3770_v61  ;;  %v3865_v60 = vld [vmem:[#allocation7 + $0x1a4] ss:$16 sps:$4 sm:$0xff]   ;;  %v3868_v61 = vld [vmem:[#allocation7 + $0x1ac] ss:$16 sps:$4 sm:$0xff]  }
  0xc0   :  { %950 = vmatprep.subr.bf16.mxu0 %v3775_v62  ;;  %1032 = vmatprep.subr.bf16.mxu1 %v3778_v63  ;;  %v3863_v62 = vld [vmem:[#allocation7 + $0x1a0] ss:$16 sps:$4 sm:$0xff]   ;;  %v3866_v63 = vld [vmem:[#allocation7 + $0x1a8] ss:$16 sps:$4 sm:$0xff]  }
  0xc3   :  { %951 = vmatpush1.bf16.msra.mxu0 %v3773_v0  ;;  %1033 = vmatpush1.bf16.msra.mxu1 %v3776_v1  ;;  %v3871_v0 = vld [vmem:[#allocation7 + $0x1c4] ss:$16 sps:$4 sm:$0xff]   ;;  %v3874_v1 = vld [vmem:[#allocation7 + $0x1cc] ss:$16 sps:$4 sm:$0xff]  }
  0xc4   :  { %952 = vmatprep.subr.bf16.mxu0 %v3781_v2  ;;  %1034 = vmatprep.subr.bf16.mxu1 %v3784_v3  ;;  %v3869_v2 = vld [vmem:[#allocation7 + $0x1c0] ss:$16 sps:$4 sm:$0xff]   ;;  %v3872_v3 = vld [vmem:[#allocation7 + $0x1c8] ss:$16 sps:$4 sm:$0xff]  }
  0xc7   :  { %953 = vmatpush1.bf16.msra.mxu0 %v3779_v4  ;;  %1035 = vmatpush1.bf16.msra.mxu1 %v3782_v5  ;;  %v3877_v4 = vld [vmem:[#allocation7 + $0x1e4] ss:$16 sps:$4 sm:$0xff]   ;;  %v3880_v5 = vld [vmem:[#allocation7 + $0x1ec] ss:$16 sps:$4 sm:$0xff]  }
  0xc8   :  { %1843 = vmatprep.subr.bf16.mxu0 %v3787_v7  ;;  %1925 = vmatprep.subr.bf16.mxu1 %v3790_v8  ;;  %v3878_v7 = vld [vmem:[#allocation7 + $0x1e8] ss:$16 sps:$4 sm:$0xff]   ;;  %v3883_v8 = vld [vmem:[#allocation7 + $0x204] ss:$16 sps:$4 sm:$0xff]  }
  0xca   :  { %955 = vmatmul.mubr.bf16.vlgmr.msra.gmra.mrb[0].mxu0 %v89_v11  ;;  %1037 = vmatmul.mubr.bf16.vlgmr.msra.gmra.mrb[0].mxu1 %v89_v11 }
  0xcb   :  { %1844 = vmatpush1.bf16.msra.mxu0 %v3785_v9  ;;  %1926 = vmatpush1.bf16.msra.mxu1 %v3788_v10  ;;  %v3886_v9 = vld [vmem:[#allocation7 + $0x20c] ss:$16 sps:$4 sm:$0xff]   ;;  %v221_v10 = vlaneseq }
  0xcc   :  { %1845 = vmatprep.subr.bf16.mxu0 %v3793_v12  ;;  %1927 = vmatprep.subr.bf16.mxu1 %v3796_v13  ;;  %v4413_v13 = vld [vmem:[%s4533_s2] sm:$0xf] }
  0xcd   :  { %v4405_v11 = vshrl.u32 %v221_v10, 7  ;;  %v3943_v10 = vld [vmem:[#allocation7 + $0x344] ss:$16 sps:$4 sm:$0xff]  }
  0xcf   :  { %1846 = vmatpush1.bf16.msra.mxu0 %v3791_v14  ;;  %1928 = vmatpush1.bf16.msra.mxu1 %v3794_v15  ;;  %v4408_v12 = vsub.s32 0, %v4405_v11  ;;  %v4416_v14 = vsub.s32 1, %v4405_v11  ;;  %v4419_v15 = vsub.s32 3, %v4405_v11  ;;  %vm2949_vm0 = vcmp.lt.s32.totalorder %v4405_v11, 6 }
  0xd0   :  { %1847 = vmatprep.subr.bf16.mxu0 %v3799_v16  ;;  %1929 = vmatprep.subr.bf16.mxu1 %v3802_v17 }
  0xd1   :  { %v224_v16 = vrot.slane %v4413_v13, %v4408_v12  ;;  %v228_v17 = vrot.slane %v4413_v13, %v4416_v14 }
  0xd3   :  { %1848 = vmatpush1.bf16.msra.mxu0 %v3797_v18  ;;  %1930 = vmatpush1.bf16.msra.mxu1 %v3800_v19  ;;  %v236_v18 = vrot.slane %v4413_v13, %v4419_v15 }
  0xd4   :  { %1849 = vmatprep.subr.bf16.mxu0 %v3805_v20  ;;  %1931 = vmatprep.subr.bf16.mxu1 %v3808_v21 }
  0xd7   :  { %1850 = vmatpush1.bf16.msra.mxu0 %v3803_v22  ;;  %1932 = vmatpush1.bf16.msra.mxu1 %v3806_v23 }
  0xd8   :  { %1851 = vmatprep.subr.bf16.mxu0 %v3811_v24  ;;  %1933 = vmatprep.subr.bf16.mxu1 %v3814_v25 }
  0xdb   :  { %1852 = vmatpush1.bf16.msra.mxu0 %v3809_v26  ;;  %1934 = vmatpush1.bf16.msra.mxu1 %v3812_v27 }
  0xdc   :  { %1853 = vmatprep.subr.bf16.mxu0 %v3817_v28  ;;  %1935 = vmatprep.subr.bf16.mxu1 %v3820_v29 }
  0xdf   :  { %1854 = vmatpush1.bf16.msra.mxu0 %v3815_v30  ;;  %1936 = vmatpush1.bf16.msra.mxu1 %v3818_v31 }
  0xe0   :  { %1855 = vmatprep.subr.bf16.mxu0 %v3823_v32  ;;  %1937 = vmatprep.subr.bf16.mxu1 %v3826_v33 }
  0xe3   :  { %1856 = vmatpush1.bf16.msra.mxu0 %v3821_v34  ;;  %1938 = vmatpush1.bf16.msra.mxu1 %v3824_v35  ;;  %v3881_v34 = vld [vmem:[#allocation7 + $0x200] ss:$16 sps:$4 sm:$0xff]   ;;  %v3884_v35 = vld [vmem:[#allocation7 + $0x208] ss:$16 sps:$4 sm:$0xff]  }
  0xe4   :  { %1857 = vmatprep.subr.bf16.mxu0 %v3829_v36  ;;  %1939 = vmatprep.subr.bf16.mxu1 %v3832_v37  ;;  %v3889_v37 = vld [vmem:[#allocation7 + $0x224] ss:$16 sps:$4 sm:$0xff]  }
  0xe7   :  { %1858 = vmatpush1.bf16.msra.mxu0 %v3827_v38  ;;  %1940 = vmatpush1.bf16.msra.mxu1 %v3830_v39  ;;  %v3892_v38 = vld [vmem:[#allocation7 + $0x22c] ss:$16 sps:$4 sm:$0xff]  }
  0xe8   :  { %1859 = vmatprep.subr.bf16.mxu0 %v3835_v40  ;;  %1941 = vmatprep.subr.bf16.mxu1 %v3838_v41  ;;  %v3887_v40 = vld [vmem:[#allocation7 + $0x220] ss:$16 sps:$4 sm:$0xff]   ;;  %v3890_v41 = vld [vmem:[#allocation7 + $0x228] ss:$16 sps:$4 sm:$0xff]  }
  0xeb   :  { %1860 = vmatpush1.bf16.msra.mxu0 %v3833_v42  ;;  %1942 = vmatpush1.bf16.msra.mxu1 %v3836_v43  ;;  %v3895_v42 = vld [vmem:[#allocation7 + $0x244] ss:$16 sps:$4 sm:$0xff]   ;;  %v3898_v43 = vld [vmem:[#allocation7 + $0x24c] ss:$16 sps:$4 sm:$0xff]  }
  0xec   :  { %1861 = vmatprep.subr.bf16.mxu0 %v3841_v44  ;;  %1943 = vmatprep.subr.bf16.mxu1 %v3844_v45  ;;  %v3893_v44 = vld [vmem:[#allocation7 + $0x240] ss:$16 sps:$4 sm:$0xff]   ;;  %v3896_v45 = vld [vmem:[#allocation7 + $0x248] ss:$16 sps:$4 sm:$0xff]  }
  0xef   :  { %1862 = vmatpush1.bf16.msra.mxu0 %v3839_v46  ;;  %1944 = vmatpush1.bf16.msra.mxu1 %v3842_v47  ;;  %v3901_v46 = vld [vmem:[#allocation7 + $0x264] ss:$16 sps:$4 sm:$0xff]   ;;  %v3904_v47 = vld [vmem:[#allocation7 + $0x26c] ss:$16 sps:$4 sm:$0xff]  }
  0xf0   :  { %1863 = vmatprep.subr.bf16.mxu0 %v3847_v48  ;;  %1945 = vmatprep.subr.bf16.mxu1 %v3850_v49  ;;  %v3899_v48 = vld [vmem:[#allocation7 + $0x260] ss:$16 sps:$4 sm:$0xff]   ;;  %v3902_v49 = vld [vmem:[#allocation7 + $0x268] ss:$16 sps:$4 sm:$0xff]  }
  0xf3   :  { %1864 = vmatpush1.bf16.msra.mxu0 %v3845_v50  ;;  %1946 = vmatpush1.bf16.msra.mxu1 %v3848_v51  ;;  %v3907_v50 = vld [vmem:[#allocation7 + $0x284] ss:$16 sps:$4 sm:$0xff]   ;;  %v3910_v51 = vld [vmem:[#allocation7 + $0x28c] ss:$16 sps:$4 sm:$0xff]  }
  0xf4   :  { %1865 = vmatprep.subr.bf16.mxu0 %v3853_v52  ;;  %1947 = vmatprep.subr.bf16.mxu1 %v3856_v53  ;;  %v3905_v52 = vld [vmem:[#allocation7 + $0x280] ss:$16 sps:$4 sm:$0xff]   ;;  %v3908_v53 = vld [vmem:[#allocation7 + $0x288] ss:$16 sps:$4 sm:$0xff]  }
  0xf7   :  { %1866 = vmatpush1.bf16.msra.mxu0 %v3851_v54  ;;  %1948 = vmatpush1.bf16.msra.mxu1 %v3854_v55  ;;  %v3913_v54 = vld [vmem:[#allocation7 + $0x2a4] ss:$16 sps:$4 sm:$0xff]   ;;  %v3916_v55 = vld [vmem:[#allocation7 + $0x2ac] ss:$16 sps:$4 sm:$0xff]  }
  0xf8   :  { %1867 = vmatprep.subr.bf16.mxu0 %v3859_v56  ;;  %1949 = vmatprep.subr.bf16.mxu1 %v3862_v57  ;;  %v3911_v56 = vld [vmem:[#allocation7 + $0x2a0] ss:$16 sps:$4 sm:$0xff]   ;;  %v3914_v57 = vld [vmem:[#allocation7 + $0x2a8] ss:$16 sps:$4 sm:$0xff]  }
  0xfb   :  { %1868 = vmatpush1.bf16.msra.mxu0 %v3857_v58  ;;  %1950 = vmatpush1.bf16.msra.mxu1 %v3860_v59  ;;  %v3919_v58 = vld [vmem:[#allocation7 + $0x2c4] ss:$16 sps:$4 sm:$0xff]   ;;  %v3922_v59 = vld [vmem:[#allocation7 + $0x2cc] ss:$16 sps:$4 sm:$0xff]  }
  0xfc   :  { %1869 = vmatprep.subr.bf16.mxu0 %v3865_v60  ;;  %1951 = vmatprep.subr.bf16.mxu1 %v3868_v61  ;;  %v3917_v60 = vld [vmem:[#allocation7 + $0x2c0] ss:$16 sps:$4 sm:$0xff]   ;;  %v3920_v61 = vld [vmem:[#allocation7 + $0x2c8] ss:$16 sps:$4 sm:$0xff]  }
  0xff   :  { %1870 = vmatpush1.bf16.msra.mxu0 %v3863_v62  ;;  %1952 = vmatpush1.bf16.msra.mxu1 %v3866_v63  ;;  %v3925_v62 = vld [vmem:[#allocation7 + $0x2e4] ss:$16 sps:$4 sm:$0xff]   ;;  %v3928_v63 = vld [vmem:[#allocation7 + $0x2ec] ss:$16 sps:$4 sm:$0xff]  }
 0x100   :  { %1871 = vmatprep.subr.bf16.mxu0 %v3871_v0  ;;  %1953 = vmatprep.subr.bf16.mxu1 %v3874_v1  ;;  %v3923_v0 = vld [vmem:[#allocation7 + $0x2e0] ss:$16 sps:$4 sm:$0xff]   ;;  %v3926_v1 = vld [vmem:[#allocation7 + $0x2e8] ss:$16 sps:$4 sm:$0xff]  }
 0x103   :  { %1872 = vmatpush1.bf16.msra.mxu0 %v3869_v2  ;;  %1954 = vmatpush1.bf16.msra.mxu1 %v3872_v3  ;;  %v3931_v2 = vld [vmem:[#allocation7 + $0x304] ss:$16 sps:$4 sm:$0xff]   ;;  %v3934_v3 = vld [vmem:[#allocation7 + $0x30c] ss:$16 sps:$4 sm:$0xff]  }
 0x104   :  { %1873 = vmatprep.subr.bf16.mxu0 %v3877_v4  ;;  %1955 = vmatprep.subr.bf16.mxu1 %v3880_v5  ;;  %v3929_v4 = vld [vmem:[#allocation7 + $0x300] ss:$16 sps:$4 sm:$0xff]   ;;  %v3932_v5 = vld [vmem:[#allocation7 + $0x308] ss:$16 sps:$4 sm:$0xff]  }
 0x107   :  { %1874 = vmatpush1.bf16.msra.mxu0 %v3875_v6  ;;  %1956 = vmatpush1.bf16.msra.mxu1 %v3878_v7  ;;  %v3937_v6 = vld [vmem:[#allocation7 + $0x324] ss:$16 sps:$4 sm:$0xff]   ;;  %v3940_v7 = vld [vmem:[#allocation7 + $0x32c] ss:$16 sps:$4 sm:$0xff]  }
 0x108   :  { %1884 = vmatprep.subr.bf16.mxu0 %v3883_v8  ;;  %1966 = vmatprep.subr.bf16.mxu1 %v3886_v9  ;;  %v3935_v8 = vld [vmem:[#allocation7 + $0x320] ss:$16 sps:$4 sm:$0xff]   ;;  %v3938_v9 = vld [vmem:[#allocation7 + $0x328] ss:$16 sps:$4 sm:$0xff]  }
 0x19d   :  { %v956_v19 = vpop.f32.mrb[0].mxu0  ;;  %v4427_v20 = vpop.f32.mrb[0].mxu1 }
 0x19e   :  { %v3553_v21 = vadd.f32 %v956_v19, %v224_v16  ;;  %v958_v22 = vpop.f32.mrb[1].mxu0  ;;  %v1040_v23 = vpop.f32.mrb[1].mxu1  ;;  %v3946_v16 = vld [vmem:[#allocation7 + $0x34c] ss:$16 sps:$4 sm:$0xff]   ;;  %v3949_v19 = vld [vmem:[#allocation7 + $0x364] ss:$16 sps:$4 sm:$0xff]  }
 0x19f   :  { %v3554_v24 = vadd.f32 %v958_v22, %v228_v17  ;;  %v3556_v25 = vadd.f32 %v1040_v23, %v236_v18  ;;  %v960_v26 = vpop.f32.mrb[2].mxu0  ;;  %v1042_v27 = vpop.f32.mrb[2].mxu1  ;;  %v3941_v17 = vld [vmem:[#allocation7 + $0x340] ss:$16 sps:$4 sm:$0xff]   ;;  %v3944_v18 = vld [vmem:[#allocation7 + $0x348] ss:$16 sps:$4 sm:$0xff]  }
 0x1a0   :  { %v1045_v28 = vmax.f32 %v3553_v21, 0.0  ;;  %v961_v29 = vpop.f32.mrb[3].mxu0  ;;  %v1043_v30 = vpop.f32.mrb[3].mxu1  ;;  %v3952_v21 = vld [vmem:[#allocation7 + $0x36c] ss:$16 sps:$4 sm:$0xff]  }
 0x1a1   :  { %v1046_v31 = vmax.f32 %v3554_v24, 0.0  ;;  %v1048_v32 = vmax.f32 %v3556_v25, 0.0  ;;  %v3947_v22 = vld [vmem:[#allocation7 + $0x360] ss:$16 sps:$4 sm:$0xff]   ;;  %v3950_v23 = vld [vmem:[#allocation7 + $0x368] ss:$16 sps:$4 sm:$0xff]  }
 0x1a2   :  { %v1049_v36 = vpack.c.bf16 %v1045_v28, %v1045_v28  ;;  %v3955_v24 = vld [vmem:[#allocation7 + $0x384] ss:$16 sps:$4 sm:$0xff]   ;;  %v3958_v25 = vld [vmem:[#allocation7 + $0x38c] ss:$16 sps:$4 sm:$0xff]   ;;  %v3953_v26 = vld [vmem:[#allocation7 + $0x380] ss:$16 sps:$4 sm:$0xff]  }
 0x1a3   :  { %v1050_v33 = vpack.c.bf16 %v1046_v31, %v1046_v31  ;;  %v1052_v39 = vpack.c.bf16 %v1048_v32, %v1048_v32  ;;  %v3956_v27 = vld [vmem:[#allocation7 + $0x388] ss:$16 sps:$4 sm:$0xff]   ;;  %v4430_v28 = vsub.s32 2, %v4405_v11  ;;  %v3961_v29 = vld [vmem:[#allocation7 + $0x3a4] ss:$16 sps:$4 sm:$0xff]  }
 0x1a4   :  { %v3964_v30 = vld [vmem:[#allocation7 + $0x3ac] ss:$16 sps:$4 sm:$0xff]   ;;  %v3959_v31 = vld [vmem:[#allocation7 + $0x3a0] ss:$16 sps:$4 sm:$0xff]   ;;  %v3962_v32 = vld [vmem:[#allocation7 + $0x3a8] ss:$16 sps:$4 sm:$0xff]  }
 0x1a5   :  { %1875 = vmatprep.mubr.bf16.mxu0 %v1050_v33  ;;  %1957 = vmatprep.mubr.bf16.mxu1 %v1050_v33  ;;  %v232_v33 = vrot.slane %v4413_v13, %v4430_v28  ;;  %v3979_v13 = vld [vmem:[#allocation8 + $0x4] ss:$16 sps:$4 sm:$0xff]  }
 0x1a6   :  { %1876 = vmatmul.mubr.bf16.vlgmr.msra.gmra.mrb[4].mxu0 %v1049_v36  ;;  %1958 = vmatmul.mubr.bf16.vlgmr.msra.gmra.mrb[4].mxu1 %v1049_v36  ;;  %v3965_v36 = vld [vmem:[#allocation7 + $0x3c0] ss:$16 sps:$4 sm:$0xff]  }
 0x1a7   :  { %1885 = vmatpush1.bf16.msra.mxu0 %v3881_v34  ;;  %1967 = vmatpush1.bf16.msra.mxu1 %v3884_v35  ;;  %v3967_v34 = vld [vmem:[#allocation7 + $0x3c4] ss:$16 sps:$4 sm:$0xff]   ;;  %v3970_v35 = vld [vmem:[#allocation7 + $0x3cc] ss:$16 sps:$4 sm:$0xff]  }
 0x1a8   :  { %1916 = vmatprep.mubr.bf16.mxu0 %v1052_v39  ;;  %1998 = vmatprep.mubr.bf16.mxu1 %v1052_v39  ;;  %v3973_v39 = vld [vmem:[#allocation7 + $0x3e4] ss:$16 sps:$4 sm:$0xff]  }
 0x1a9   :  { %1886 = vmatprep.subr.bf16.mxu0 %v3889_v37  ;;  %1968 = vmatprep.subr.bf16.mxu1 %v3892_v38  ;;  %v3968_v37 = vld [vmem:[#allocation7 + $0x3c8] ss:$16 sps:$4 sm:$0xff]   ;;  %v3555_v38 = vadd.f32 %v4427_v20, %v232_v33  ;;  %v3985_v20 = vld [vmem:[#allocation8 + $0x24] ss:$16 sps:$4 sm:$0xff]  }
 0x1aa   :  { %v4046_v33 = vld [vmem:[#allocation8 + $0x168] ss:$16 sps:$4 sm:$0xff]  }
 0x1ab   :  { %1887 = vmatpush1.bf16.msra.mxu0 %v3887_v40  ;;  %1969 = vmatpush1.bf16.msra.mxu1 %v3890_v41  ;;  %v3976_v40 = vld [vmem:[#allocation7 + $0x3ec] ss:$16 sps:$4 sm:$0xff]   ;;  %v3971_v41 = vld [vmem:[#allocation7 + $0x3e0] ss:$16 sps:$4 sm:$0xff]  }
 0x1ac   :  { %1888 = vmatprep.subr.bf16.mxu0 %v3895_v42  ;;  %1970 = vmatprep.subr.bf16.mxu1 %v3898_v43  ;;  %v3974_v42 = vld [vmem:[#allocation7 + $0x3e8] ss:$16 sps:$4 sm:$0xff]   ;;  %v1047_v43 = vmax.f32 %v3555_v38, 0.0  ;;  %v4057_v38 = vld [vmem:[#allocation8 + $0x1a4] ss:$16 sps:$4 sm:$0xff]  }
 0x1af   :  { %1889 = vmatpush1.bf16.msra.mxu0 %v3893_v44  ;;  %1971 = vmatpush1.bf16.msra.mxu1 %v3896_v45  ;;  %v3982_v44 = vld [vmem:[#allocation8 + $0xc] ss:$16 sps:$4 sm:$0xff]   ;;  %v3977_v45 = vld [vmem:[#allocation8] ss:$16 sps:$4 sm:$0xff]  }
 0x1b0   :  { %1890 = vmatprep.subr.bf16.mxu0 %v3901_v46  ;;  %1972 = vmatprep.subr.bf16.mxu1 %v3904_v47  ;;  %v3980_v46 = vld [vmem:[#allocation8 + $0x8] ss:$16 sps:$4 sm:$0xff]   ;;  %v1051_v47 = vpack.c.bf16 %v1047_v43, %v1047_v43  ;;  %v4066_v43 = vld [vmem:[#allocation8 + $0x1cc] ss:$16 sps:$4 sm:$0xff]  }
 0x1b3   :  { %1891 = vmatpush1.bf16.msra.mxu0 %v3899_v48  ;;  %1973 = vmatpush1.bf16.msra.mxu1 %v3902_v49  ;;  %v3988_v48 = vld [vmem:[#allocation8 + $0x2c] ss:$16 sps:$4 sm:$0xff]   ;;  %v3983_v49 = vld [vmem:[#allocation8 + $0x20] ss:$16 sps:$4 sm:$0xff]  }
 0x1b4   :  { %1892 = vmatprep.subr.bf16.mxu0 %v3907_v50  ;;  %1974 = vmatprep.subr.bf16.mxu1 %v3910_v51  ;;  %v3986_v50 = vld [vmem:[#allocation8 + $0x28] ss:$16 sps:$4 sm:$0xff]   ;;  %v3991_v51 = vld [vmem:[#allocation8 + $0x44] ss:$16 sps:$4 sm:$0xff]  }
 0x1b7   :  { %1893 = vmatpush1.bf16.msra.mxu0 %v3905_v52  ;;  %1975 = vmatpush1.bf16.msra.mxu1 %v3908_v53  ;;  %v3994_v52 = vld [vmem:[#allocation8 + $0x4c] ss:$16 sps:$4 sm:$0xff]   ;;  %v3989_v53 = vld [vmem:[#allocation8 + $0x40] ss:$16 sps:$4 sm:$0xff]  }
 0x1b8   :  { %1894 = vmatprep.subr.bf16.mxu0 %v3913_v54  ;;  %1976 = vmatprep.subr.bf16.mxu1 %v3916_v55  ;;  %v3992_v54 = vld [vmem:[#allocation8 + $0x48] ss:$16 sps:$4 sm:$0xff]   ;;  %v3997_v55 = vld [vmem:[#allocation8 + $0x64] ss:$16 sps:$4 sm:$0xff]  }
 0x1bb   :  { %1895 = vmatpush1.bf16.msra.mxu0 %v3911_v56  ;;  %1977 = vmatpush1.bf16.msra.mxu1 %v3914_v57  ;;  %v4000_v56 = vld [vmem:[#allocation8 + $0x6c] ss:$16 sps:$4 sm:$0xff]   ;;  %v3995_v57 = vld [vmem:[#allocation8 + $0x60] ss:$16 sps:$4 sm:$0xff]  }
 0x1bc   :  { %1896 = vmatprep.subr.bf16.mxu0 %v3919_v58  ;;  %1978 = vmatprep.subr.bf16.mxu1 %v3922_v59  ;;  %v3998_v58 = vld [vmem:[#allocation8 + $0x68] ss:$16 sps:$4 sm:$0xff]   ;;  %v4003_v59 = vld [vmem:[#allocation8 + $0x84] ss:$16 sps:$4 sm:$0xff]  }
 0x1bf   :  { %1897 = vmatpush1.bf16.msra.mxu0 %v3917_v60  ;;  %1979 = vmatpush1.bf16.msra.mxu1 %v3920_v61  ;;  %v4006_v60 = vld [vmem:[#allocation8 + $0x8c] ss:$16 sps:$4 sm:$0xff]   ;;  %v4001_v61 = vld [vmem:[#allocation8 + $0x80] ss:$16 sps:$4 sm:$0xff]  }
 0x1c0   :  { %1898 = vmatprep.subr.bf16.mxu0 %v3925_v62  ;;  %1980 = vmatprep.subr.bf16.mxu1 %v3928_v63  ;;  %v4004_v62 = vld [vmem:[#allocation8 + $0x88] ss:$16 sps:$4 sm:$0xff]   ;;  %v4009_v63 = vld [vmem:[#allocation8 + $0xa4] ss:$16 sps:$4 sm:$0xff]  }
 0x1c3   :  { %1899 = vmatpush1.bf16.msra.mxu0 %v3923_v0  ;;  %1981 = vmatpush1.bf16.msra.mxu1 %v3926_v1  ;;  %v4012_v0 = vld [vmem:[#allocation8 + $0xac] ss:$16 sps:$4 sm:$0xff]   ;;  %v4007_v1 = vld [vmem:[#allocation8 + $0xa0] ss:$16 sps:$4 sm:$0xff]  }
 0x1c4   :  { %1900 = vmatprep.subr.bf16.mxu0 %v3931_v2  ;;  %1982 = vmatprep.subr.bf16.mxu1 %v3934_v3  ;;  %v4010_v2 = vld [vmem:[#allocation8 + $0xa8] ss:$16 sps:$4 sm:$0xff]   ;;  %v4015_v3 = vld [vmem:[#allocation8 + $0xc4] ss:$16 sps:$4 sm:$0xff]  }
 0x1c7   :  { %1901 = vmatpush1.bf16.msra.mxu0 %v3929_v4  ;;  %1983 = vmatpush1.bf16.msra.mxu1 %v3932_v5  ;;  %v4018_v4 = vld [vmem:[#allocation8 + $0xcc] ss:$16 sps:$4 sm:$0xff]   ;;  %v4013_v5 = vld [vmem:[#allocation8 + $0xc0] ss:$16 sps:$4 sm:$0xff]  }
 0x1c8   :  { %1902 = vmatprep.subr.bf16.mxu0 %v3937_v6  ;;  %1984 = vmatprep.subr.bf16.mxu1 %v3940_v7  ;;  %v4016_v6 = vld [vmem:[#allocation8 + $0xc8] ss:$16 sps:$4 sm:$0xff]   ;;  %v4021_v7 = vld [vmem:[#allocation8 + $0xe4] ss:$16 sps:$4 sm:$0xff]  }
 0x1cb   :  { %1903 = vmatpush1.bf16.msra.mxu0 %v3935_v8  ;;  %1985 = vmatpush1.bf16.msra.mxu1 %v3938_v9  ;;  %v4024_v8 = vld [vmem:[#allocation8 + $0xec] ss:$16 sps:$4 sm:$0xff]   ;;  %v4019_v9 = vld [vmem:[#allocation8 + $0xe0] ss:$16 sps:$4 sm:$0xff]  }
 0x1cc   :  { %1904 = vmatprep.subr.bf16.mxu0 %v3943_v10  ;;  %1986 = vmatprep.subr.bf16.mxu1 %v3946_v16  ;;  %v4022_v10 = vld [vmem:[#allocation8 + $0xe8] ss:$16 sps:$4 sm:$0xff]   ;;  %v4027_v16 = vld [vmem:[#allocation8 + $0x104] ss:$16 sps:$4 sm:$0xff]  }
 0x1cf   :  { %1905 = vmatpush1.bf16.msra.mxu0 %v3941_v17  ;;  %1987 = vmatpush1.bf16.msra.mxu1 %v3944_v18  ;;  %v4030_v17 = vld [vmem:[#allocation8 + $0x10c] ss:$16 sps:$4 sm:$0xff]   ;;  %v4025_v18 = vld [vmem:[#allocation8 + $0x100] ss:$16 sps:$4 sm:$0xff]  }
 0x1d0   :  { %1906 = vmatprep.subr.bf16.mxu0 %v3949_v19  ;;  %1988 = vmatprep.subr.bf16.mxu1 %v3952_v21  ;;  %v4028_v19 = vld [vmem:[#allocation8 + $0x108] ss:$16 sps:$4 sm:$0xff]   ;;  %v4033_v21 = vld [vmem:[#allocation8 + $0x124] ss:$16 sps:$4 sm:$0xff]  }
 0x1d3   :  { %1907 = vmatpush1.bf16.msra.mxu0 %v3947_v22  ;;  %1989 = vmatpush1.bf16.msra.mxu1 %v3950_v23  ;;  %v4036_v22 = vld [vmem:[#allocation8 + $0x12c] ss:$16 sps:$4 sm:$0xff]   ;;  %v4031_v23 = vld [vmem:[#allocation8 + $0x120] ss:$16 sps:$4 sm:$0xff]  }
 0x1d4   :  { %1908 = vmatprep.subr.bf16.mxu0 %v3955_v24  ;;  %1990 = vmatprep.subr.bf16.mxu1 %v3958_v25  ;;  %v4034_v24 = vld [vmem:[#allocation8 + $0x128] ss:$16 sps:$4 sm:$0xff]   ;;  %v4039_v25 = vld [vmem:[#allocation8 + $0x144] ss:$16 sps:$4 sm:$0xff]  }
 0x1d7   :  { %1909 = vmatpush1.bf16.msra.mxu0 %v3953_v26  ;;  %1991 = vmatpush1.bf16.msra.mxu1 %v3956_v27  ;;  %v4042_v26 = vld [vmem:[#allocation8 + $0x14c] ss:$16 sps:$4 sm:$0xff]   ;;  %v4037_v27 = vld [vmem:[#allocation8 + $0x140] ss:$16 sps:$4 sm:$0xff]  }
 0x1d8   :  { %1910 = vmatprep.subr.bf16.mxu0 %v3961_v29  ;;  %1992 = vmatprep.subr.bf16.mxu1 %v3964_v30  ;;  %v4040_v29 = vld [vmem:[#allocation8 + $0x148] ss:$16 sps:$4 sm:$0xff]   ;;  %v4045_v30 = vld [vmem:[#allocation8 + $0x164] ss:$16 sps:$4 sm:$0xff]  }
 0x1db   :  { %1911 = vmatpush1.bf16.msra.mxu0 %v3959_v31  ;;  %1993 = vmatpush1.bf16.msra.mxu1 %v3962_v32  ;;  %v4048_v31 = vld [vmem:[#allocation8 + $0x16c] ss:$16 sps:$4 sm:$0xff]   ;;  %v4043_v32 = vld [vmem:[#allocation8 + $0x160] ss:$16 sps:$4 sm:$0xff]  }
 0x1dc   :  { %1912 = vmatprep.subr.bf16.mxu0 %v3967_v34  ;;  %1994 = vmatprep.subr.bf16.mxu1 %v3970_v35  ;;  %v4051_v34 = vld [vmem:[#allocation8 + $0x184] ss:$16 sps:$4 sm:$0xff]   ;;  %v4054_v35 = vld [vmem:[#allocation8 + $0x18c] ss:$16 sps:$4 sm:$0xff]  }
 0x1df   :  { %1913 = vmatpush1.bf16.msra.mxu0 %v3965_v36  ;;  %1995 = vmatpush1.bf16.msra.mxu1 %v3968_v37  ;;  %v4049_v36 = vld [vmem:[#allocation8 + $0x180] ss:$16 sps:$4 sm:$0xff]   ;;  %v4052_v37 = vld [vmem:[#allocation8 + $0x188] ss:$16 sps:$4 sm:$0xff]  }
 0x1e0   :  { %1914 = vmatprep.subr.bf16.mxu0 %v3973_v39  ;;  %1996 = vmatprep.subr.bf16.mxu1 %v3976_v40  ;;  %v4060_v39 = vld [vmem:[#allocation8 + $0x1ac] ss:$16 sps:$4 sm:$0xff]   ;;  %v4055_v40 = vld [vmem:[#allocation8 + $0x1a0] ss:$16 sps:$4 sm:$0xff]  }
 0x1e3   :  { %1915 = vmatpush1.bf16.msra.mxu0 %v3971_v41  ;;  %1997 = vmatpush1.bf16.msra.mxu1 %v3974_v42  ;;  %v4058_v41 = vld [vmem:[#allocation8 + $0x1a8] ss:$16 sps:$4 sm:$0xff]   ;;  %v4063_v42 = vld [vmem:[#allocation8 + $0x1c4] ss:$16 sps:$4 sm:$0xff]  }
 0x1e4   :  { %2783 = vmatprep.subr.bf16.mxu0 %v3979_v13  ;;  %2865 = vmatprep.subr.bf16.mxu1 %v3982_v44  ;;  %v4061_v13 = vld [vmem:[#allocation8 + $0x1c0] ss:$16 sps:$4 sm:$0xff]   ;;  %v4064_v44 = vld [vmem:[#allocation8 + $0x1c8] ss:$16 sps:$4 sm:$0xff]  }
 0x1e6   :  { %1917 = vmatmul.mubr.bf16.vlgmr.msra.gmra.mrb[4].mxu0 %v1051_v47  ;;  %1999 = vmatmul.mubr.bf16.vlgmr.msra.gmra.mrb[4].mxu1 %v1051_v47  ;;  %v4067_v47 = vld [vmem:[#allocation8 + $0x1e0] ss:$16 sps:$4 sm:$0xff]  }
 0x1e7   :  { %2784 = vmatpush1.bf16.msra.mxu0 %v3977_v45  ;;  %2866 = vmatpush1.bf16.msra.mxu1 %v3980_v46  ;;  %v4069_v45 = vld [vmem:[#allocation8 + $0x1e4] ss:$16 sps:$4 sm:$0xff]   ;;  %v4072_v46 = vld [vmem:[#allocation8 + $0x1ec] ss:$16 sps:$4 sm:$0xff]  }
 0x1e8   :  { %2785 = vmatprep.subr.bf16.mxu0 %v3985_v20  ;;  %2867 = vmatprep.subr.bf16.mxu1 %v3988_v48  ;;  %v4070_v20 = vld [vmem:[#allocation8 + $0x1e8] ss:$16 sps:$4 sm:$0xff]   ;;  %v4075_v48 = vld [vmem:[#allocation8 + $0x204] ss:$16 sps:$4 sm:$0xff]  }
 0x1eb   :  { %2786 = vmatpush1.bf16.msra.mxu0 %v3983_v49  ;;  %2868 = vmatpush1.bf16.msra.mxu1 %v3986_v50  ;;  %v4078_v49 = vld [vmem:[#allocation8 + $0x20c] ss:$16 sps:$4 sm:$0xff]   ;;  %v4438_v50 = vld [vmem:[%s4535_s4] sm:$0xf] }
 0x1ec   :  { %2787 = vmatprep.subr.bf16.mxu0 %v3991_v51  ;;  %2869 = vmatprep.subr.bf16.mxu1 %v3994_v52  ;;  %v1186_v51 = vrot.slane %v4438_v50, %v4408_v12  ;;  %v1190_v52 = vrot.slane %v4438_v50, %v4416_v14 }
 0x1ef   :  { %2788 = vmatpush1.bf16.msra.mxu0 %v3989_v53  ;;  %2870 = vmatpush1.bf16.msra.mxu1 %v3992_v54  ;;  %v1198_v53 = vrot.slane %v4438_v50, %v4419_v15 }
 0x1f0   :  { %2789 = vmatprep.subr.bf16.mxu0 %v3997_v55  ;;  %2871 = vmatprep.subr.bf16.mxu1 %v4000_v56 }
 0x1f3   :  { %2790 = vmatpush1.bf16.msra.mxu0 %v3995_v57  ;;  %2872 = vmatpush1.bf16.msra.mxu1 %v3998_v58 }
 0x1f4   :  { %2791 = vmatprep.subr.bf16.mxu0 %v4003_v59  ;;  %2873 = vmatprep.subr.bf16.mxu1 %v4006_v60 }
 0x1f7   :  { %2792 = vmatpush1.bf16.msra.mxu0 %v4001_v61  ;;  %2874 = vmatpush1.bf16.msra.mxu1 %v4004_v62 }
 0x1f8   :  { %2793 = vmatprep.subr.bf16.mxu0 %v4009_v63  ;;  %2875 = vmatprep.subr.bf16.mxu1 %v4012_v0 }
 0x1fb   :  { %2794 = vmatpush1.bf16.msra.mxu0 %v4007_v1  ;;  %2876 = vmatpush1.bf16.msra.mxu1 %v4010_v2 }
 0x1fc   :  { %2795 = vmatprep.subr.bf16.mxu0 %v4015_v3  ;;  %2877 = vmatprep.subr.bf16.mxu1 %v4018_v4 }
 0x1ff   :  { %2796 = vmatpush1.bf16.msra.mxu0 %v4013_v5  ;;  %2878 = vmatpush1.bf16.msra.mxu1 %v4016_v6  ;;  %v4073_v5 = vld [vmem:[#allocation8 + $0x200] ss:$16 sps:$4 sm:$0xff]   ;;  %v4076_v6 = vld [vmem:[#allocation8 + $0x208] ss:$16 sps:$4 sm:$0xff]  }
 0x200   :  { %2797 = vmatprep.subr.bf16.mxu0 %v4021_v7  ;;  %2879 = vmatprep.subr.bf16.mxu1 %v4024_v8  ;;  %v4081_v8 = vld [vmem:[#allocation8 + $0x224] ss:$16 sps:$4 sm:$0xff]  }
 0x203   :  { %2798 = vmatpush1.bf16.msra.mxu0 %v4019_v9  ;;  %2880 = vmatpush1.bf16.msra.mxu1 %v4022_v10  ;;  %v4084_v9 = vld [vmem:[#allocation8 + $0x22c] ss:$16 sps:$4 sm:$0xff]  }
 0x204   :  { %2799 = vmatprep.subr.bf16.mxu0 %v4027_v16  ;;  %2881 = vmatprep.subr.bf16.mxu1 %v4030_v17  ;;  %v4079_v16 = vld [vmem:[#allocation8 + $0x220] ss:$16 sps:$4 sm:$0xff]   ;;  %v4082_v17 = vld [vmem:[#allocation8 + $0x228] ss:$16 sps:$4 sm:$0xff]  }
 0x207   :  { %2800 = vmatpush1.bf16.msra.mxu0 %v4025_v18  ;;  %2882 = vmatpush1.bf16.msra.mxu1 %v4028_v19  ;;  %v4087_v18 = vld [vmem:[#allocation8 + $0x244] ss:$16 sps:$4 sm:$0xff]   ;;  %v4090_v19 = vld [vmem:[#allocation8 + $0x24c] ss:$16 sps:$4 sm:$0xff]  }
 0x208   :  { %2801 = vmatprep.subr.bf16.mxu0 %v4033_v21  ;;  %2883 = vmatprep.subr.bf16.mxu1 %v4036_v22  ;;  %v4085_v21 = vld [vmem:[#allocation8 + $0x240] ss:$16 sps:$4 sm:$0xff]   ;;  %v4088_v22 = vld [vmem:[#allocation8 + $0x248] ss:$16 sps:$4 sm:$0xff]  }
 0x20b   :  { %2802 = vmatpush1.bf16.msra.mxu0 %v4031_v23  ;;  %2884 = vmatpush1.bf16.msra.mxu1 %v4034_v24  ;;  %v4093_v23 = vld [vmem:[#allocation8 + $0x264] ss:$16 sps:$4 sm:$0xff]   ;;  %v4096_v24 = vld [vmem:[#allocation8 + $0x26c] ss:$16 sps:$4 sm:$0xff]  }
 0x20c   :  { %2803 = vmatprep.subr.bf16.mxu0 %v4039_v25  ;;  %2885 = vmatprep.subr.bf16.mxu1 %v4042_v26  ;;  %v4091_v25 = vld [vmem:[#allocation8 + $0x260] ss:$16 sps:$4 sm:$0xff]   ;;  %v4094_v26 = vld [vmem:[#allocation8 + $0x268] ss:$16 sps:$4 sm:$0xff]  }
 0x20f   :  { %2804 = vmatpush1.bf16.msra.mxu0 %v4037_v27  ;;  %2886 = vmatpush1.bf16.msra.mxu1 %v4040_v29  ;;  %v4099_v27 = vld [vmem:[#allocation8 + $0x284] ss:$16 sps:$4 sm:$0xff]   ;;  %v4102_v29 = vld [vmem:[#allocation8 + $0x28c] ss:$16 sps:$4 sm:$0xff]  }
 0x210   :  { %2805 = vmatprep.subr.bf16.mxu0 %v4045_v30  ;;  %2887 = vmatprep.subr.bf16.mxu1 %v4048_v31  ;;  %v4097_v30 = vld [vmem:[#allocation8 + $0x280] ss:$16 sps:$4 sm:$0xff]   ;;  %v4100_v31 = vld [vmem:[#allocation8 + $0x288] ss:$16 sps:$4 sm:$0xff]  }
 0x213   :  { %2806 = vmatpush1.bf16.msra.mxu0 %v4043_v32  ;;  %2888 = vmatpush1.bf16.msra.mxu1 %v4046_v33  ;;  %v4105_v32 = vld [vmem:[#allocation8 + $0x2a4] ss:$16 sps:$4 sm:$0xff]   ;;  %v4108_v33 = vld [vmem:[#allocation8 + $0x2ac] ss:$16 sps:$4 sm:$0xff]  }
 0x214   :  { %2807 = vmatprep.subr.bf16.mxu0 %v4051_v34  ;;  %2889 = vmatprep.subr.bf16.mxu1 %v4054_v35  ;;  %v4103_v34 = vld [vmem:[#allocation8 + $0x2a0] ss:$16 sps:$4 sm:$0xff]   ;;  %v4106_v35 = vld [vmem:[#allocation8 + $0x2a8] ss:$16 sps:$4 sm:$0xff]  }
 0x217   :  { %2808 = vmatpush1.bf16.msra.mxu0 %v4049_v36  ;;  %2890 = vmatpush1.bf16.msra.mxu1 %v4052_v37  ;;  %v4111_v36 = vld [vmem:[#allocation8 + $0x2c4] ss:$16 sps:$4 sm:$0xff]   ;;  %v4114_v37 = vld [vmem:[#allocation8 + $0x2cc] ss:$16 sps:$4 sm:$0xff]  }
 0x218   :  { %2809 = vmatprep.subr.bf16.mxu0 %v4057_v38  ;;  %2891 = vmatprep.subr.bf16.mxu1 %v4060_v39  ;;  %v4109_v38 = vld [vmem:[#allocation8 + $0x2c0] ss:$16 sps:$4 sm:$0xff]   ;;  %v4112_v39 = vld [vmem:[#allocation8 + $0x2c8] ss:$16 sps:$4 sm:$0xff]  }
 0x21b   :  { %2810 = vmatpush1.bf16.msra.mxu0 %v4055_v40  ;;  %2892 = vmatpush1.bf16.msra.mxu1 %v4058_v41  ;;  %v4117_v40 = vld [vmem:[#allocation8 + $0x2e4] ss:$16 sps:$4 sm:$0xff]   ;;  %v4120_v41 = vld [vmem:[#allocation8 + $0x2ec] ss:$16 sps:$4 sm:$0xff]  }
 0x21c   :  { %2811 = vmatprep.subr.bf16.mxu0 %v4063_v42  ;;  %2893 = vmatprep.subr.bf16.mxu1 %v4066_v43  ;;  %v4115_v42 = vld [vmem:[#allocation8 + $0x2e0] ss:$16 sps:$4 sm:$0xff]   ;;  %v4118_v43 = vld [vmem:[#allocation8 + $0x2e8] ss:$16 sps:$4 sm:$0xff]  }
 0x21f   :  { %2812 = vmatpush1.bf16.msra.mxu0 %v4061_v13  ;;  %2894 = vmatpush1.bf16.msra.mxu1 %v4064_v44  ;;  %v4123_v13 = vld [vmem:[#allocation8 + $0x304] ss:$16 sps:$4 sm:$0xff]   ;;  %v4126_v44 = vld [vmem:[#allocation8 + $0x30c] ss:$16 sps:$4 sm:$0xff]  }
 0x220   :  { %2813 = vmatprep.subr.bf16.mxu0 %v4069_v45  ;;  %2895 = vmatprep.subr.bf16.mxu1 %v4072_v46  ;;  %v4121_v45 = vld [vmem:[#allocation8 + $0x300] ss:$16 sps:$4 sm:$0xff]   ;;  %v4124_v46 = vld [vmem:[#allocation8 + $0x308] ss:$16 sps:$4 sm:$0xff]  }
 0x223   :  { %2814 = vmatpush1.bf16.msra.mxu0 %v4067_v47  ;;  %2896 = vmatpush1.bf16.msra.mxu1 %v4070_v20  ;;  %v4129_v47 = vld [vmem:[#allocation8 + $0x324] ss:$16 sps:$4 sm:$0xff]   ;;  %v4132_v20 = vld [vmem:[#allocation8 + $0x32c] ss:$16 sps:$4 sm:$0xff]  }
 0x224   :  { %2824 = vmatprep.subr.bf16.mxu0 %v4075_v48  ;;  %2906 = vmatprep.subr.bf16.mxu1 %v4078_v49  ;;  %v4127_v48 = vld [vmem:[#allocation8 + $0x320] ss:$16 sps:$4 sm:$0xff]   ;;  %v4130_v49 = vld [vmem:[#allocation8 + $0x328] ss:$16 sps:$4 sm:$0xff]  }
 0x2b9   :  { %v1918_v54 = vpop.f32.mrb[4].mxu0  ;;  %v4446_v55 = vpop.f32.mrb[4].mxu1 }
 0x2ba   :  { %v3557_v56 = vadd.f32 %v1918_v54, %v1186_v51  ;;  %v1920_v57 = vpop.f32.mrb[5].mxu0  ;;  %v2002_v58 = vpop.f32.mrb[5].mxu1  ;;  %v4135_v51 = vld [vmem:[#allocation8 + $0x344] ss:$16 sps:$4 sm:$0xff]   ;;  %v4136_v54 = vld [vmem:[#allocation8 + $0x348] ss:$16 sps:$4 sm:$0xff]  }
 0x2bb   :  { %v3558_v59 = vadd.f32 %v1920_v57, %v1190_v52  ;;  %v3560_v60 = vadd.f32 %v2002_v58, %v1198_v53  ;;  %v1922_v61 = vpop.f32.mrb[6].mxu0  ;;  %v2004_v62 = vpop.f32.mrb[6].mxu1  ;;  %v4138_v52 = vld [vmem:[#allocation8 + $0x34c] ss:$16 sps:$4 sm:$0xff]   ;;  %v4133_v53 = vld [vmem:[#allocation8 + $0x340] ss:$16 sps:$4 sm:$0xff]  }
 0x2bc   :  { %v2007_v63 = vmax.f32 %v3557_v56, 0.0  ;;  %v1923_v0 = vpop.f32.mrb[7].mxu0  ;;  %v2005_v1 = vpop.f32.mrb[7].mxu1  ;;  %v4141_v56 = vld [vmem:[#allocation8 + $0x364] ss:$16 sps:$4 sm:$0xff]  }
 0x2bd   :  { %v2008_v2 = vmax.f32 %v3558_v59, 0.0  ;;  %v2010_v3 = vmax.f32 %v3560_v60, 0.0  ;;  %v4144_v57 = vld [vmem:[#allocation8 + $0x36c] ss:$16 sps:$4 sm:$0xff]   ;;  %v4139_v58 = vld [vmem:[#allocation8 + $0x360] ss:$16 sps:$4 sm:$0xff]  }
 0x2be   :  { %v2011_v7 = vpack.c.bf16 %v2007_v63, %v2007_v63  ;;  %v4142_v59 = vld [vmem:[#allocation8 + $0x368] ss:$16 sps:$4 sm:$0xff]   ;;  %v4147_v60 = vld [vmem:[#allocation8 + $0x384] ss:$16 sps:$4 sm:$0xff]   ;;  %v4150_v61 = vld [vmem:[#allocation8 + $0x38c] ss:$16 sps:$4 sm:$0xff]  }
 0x2bf   :  { %v2012_v4 = vpack.c.bf16 %v2008_v2, %v2008_v2  ;;  %v2014_v10 = vpack.c.bf16 %v2010_v3, %v2010_v3  ;;  %v4145_v62 = vld [vmem:[#allocation8 + $0x380] ss:$16 sps:$4 sm:$0xff]   ;;  %v4148_v63 = vld [vmem:[#allocation8 + $0x388] ss:$16 sps:$4 sm:$0xff]   ;;  %v4153_v0 = vld [vmem:[#allocation8 + $0x3a4] ss:$16 sps:$4 sm:$0xff]  }
 0x2c0   :  { %v4156_v1 = vld [vmem:[#allocation8 + $0x3ac] ss:$16 sps:$4 sm:$0xff]   ;;  %v4151_v2 = vld [vmem:[#allocation8 + $0x3a0] ss:$16 sps:$4 sm:$0xff]   ;;  %v4154_v3 = vld [vmem:[#allocation8 + $0x3a8] ss:$16 sps:$4 sm:$0xff]  }
 0x2c1   :  { %2815 = vmatprep.mubr.bf16.mxu0 %v2012_v4  ;;  %2897 = vmatprep.mubr.bf16.mxu1 %v2012_v4  ;;  %v1194_v4 = vrot.slane %v4438_v50, %v4430_v28 }
 0x2c2   :  { %2816 = vmatmul.mubr.bf16.vlgmr.msra.gmra.mrb[8].mxu0 %v2011_v7  ;;  %2898 = vmatmul.mubr.bf16.vlgmr.msra.gmra.mrb[8].mxu1 %v2011_v7  ;;  %v4157_v7 = vld [vmem:[#allocation8 + $0x3c0] ss:$16 sps:$4 sm:$0xff]  }
 0x2c3   :  { %2825 = vmatpush1.bf16.msra.mxu0 %v4073_v5  ;;  %2907 = vmatpush1.bf16.msra.mxu1 %v4076_v6  ;;  %v4159_v5 = vld [vmem:[#allocation8 + $0x3c4] ss:$16 sps:$4 sm:$0xff]   ;;  %v4162_v6 = vld [vmem:[#allocation8 + $0x3cc] ss:$16 sps:$4 sm:$0xff]  }
 0x2c4   :  { %2856 = vmatprep.mubr.bf16.mxu0 %v2014_v10  ;;  %2938 = vmatprep.mubr.bf16.mxu1 %v2014_v10  ;;  %v4165_v10 = vld [vmem:[#allocation8 + $0x3e4] ss:$16 sps:$4 sm:$0xff]  }
 0x2c5   :  { %2826 = vmatprep.subr.bf16.mxu0 %v4081_v8  ;;  %2908 = vmatprep.subr.bf16.mxu1 %v4084_v9  ;;  %v4160_v8 = vld [vmem:[#allocation8 + $0x3c8] ss:$16 sps:$4 sm:$0xff]   ;;  %v3559_v9 = vadd.f32 %v4446_v55, %v1194_v4 }
 0x2c7   :  { %2827 = vmatpush1.bf16.msra.mxu0 %v4079_v16  ;;  %2909 = vmatpush1.bf16.msra.mxu1 %v4082_v17  ;;  %v4168_v16 = vld [vmem:[#allocation8 + $0x3ec] ss:$16 sps:$4 sm:$0xff]   ;;  %v4163_v17 = vld [vmem:[#allocation8 + $0x3e0] ss:$16 sps:$4 sm:$0xff]  }
 0x2c8   :  { %2828 = vmatprep.subr.bf16.mxu0 %v4087_v18  ;;  %2910 = vmatprep.subr.bf16.mxu1 %v4090_v19  ;;  %v4166_v18 = vld [vmem:[#allocation8 + $0x3e8] ss:$16 sps:$4 sm:$0xff]   ;;  %v2009_v19 = vmax.f32 %v3559_v9, 0.0 }
 0x2ca   :  { %v2013_v50 = vpack.c.bf16 %v2009_v19, %v2009_v19 }
 0x2cb   :  { %2829 = vmatpush1.bf16.msra.mxu0 %v4085_v21  ;;  %2911 = vmatpush1.bf16.msra.mxu1 %v4088_v22 }
 0x2cc   :  { %2830 = vmatprep.subr.bf16.mxu0 %v4093_v23  ;;  %2912 = vmatprep.subr.bf16.mxu1 %v4096_v24 }
 0x2cf   :  { %2831 = vmatpush1.bf16.msra.mxu0 %v4091_v25  ;;  %2913 = vmatpush1.bf16.msra.mxu1 %v4094_v26 }
 0x2d0   :  { %2832 = vmatprep.subr.bf16.mxu0 %v4099_v27  ;;  %2914 = vmatprep.subr.bf16.mxu1 %v4102_v29 }
 0x2d3   :  { %2833 = vmatpush1.bf16.msra.mxu0 %v4097_v30  ;;  %2915 = vmatpush1.bf16.msra.mxu1 %v4100_v31 }
 0x2d4   :  { %2834 = vmatprep.subr.bf16.mxu0 %v4105_v32  ;;  %2916 = vmatprep.subr.bf16.mxu1 %v4108_v33 }
 0x2d7   :  { %2835 = vmatpush1.bf16.msra.mxu0 %v4103_v34  ;;  %2917 = vmatpush1.bf16.msra.mxu1 %v4106_v35 }
 0x2d8   :  { %2836 = vmatprep.subr.bf16.mxu0 %v4111_v36  ;;  %2918 = vmatprep.subr.bf16.mxu1 %v4114_v37 }
 0x2db   :  { %2837 = vmatpush1.bf16.msra.mxu0 %v4109_v38  ;;  %2919 = vmatpush1.bf16.msra.mxu1 %v4112_v39 }
 0x2dc   :  { %2838 = vmatprep.subr.bf16.mxu0 %v4117_v40  ;;  %2920 = vmatprep.subr.bf16.mxu1 %v4120_v41 }
 0x2df   :  { %2839 = vmatpush1.bf16.msra.mxu0 %v4115_v42  ;;  %2921 = vmatpush1.bf16.msra.mxu1 %v4118_v43 }
 0x2e0   :  { %2840 = vmatprep.subr.bf16.mxu0 %v4123_v13  ;;  %2922 = vmatprep.subr.bf16.mxu1 %v4126_v44 }
 0x2e3   :  { %2841 = vmatpush1.bf16.msra.mxu0 %v4121_v45  ;;  %2923 = vmatpush1.bf16.msra.mxu1 %v4124_v46 }
 0x2e4   :  { %2842 = vmatprep.subr.bf16.mxu0 %v4129_v47  ;;  %2924 = vmatprep.subr.bf16.mxu1 %v4132_v20 }
 0x2e7   :  { %2843 = vmatpush1.bf16.msra.mxu0 %v4127_v48  ;;  %2925 = vmatpush1.bf16.msra.mxu1 %v4130_v49 }
 0x2e8   :  { %2844 = vmatprep.subr.bf16.mxu0 %v4135_v51  ;;  %2926 = vmatprep.subr.bf16.mxu1 %v4138_v52 }
 0x2eb   :  { %2845 = vmatpush1.bf16.msra.mxu0 %v4133_v53  ;;  %2927 = vmatpush1.bf16.msra.mxu1 %v4136_v54 }
 0x2ec   :  { %2846 = vmatprep.subr.bf16.mxu0 %v4141_v56  ;;  %2928 = vmatprep.subr.bf16.mxu1 %v4144_v57 }
 0x2ef   :  { %2847 = vmatpush1.bf16.msra.mxu0 %v4139_v58  ;;  %2929 = vmatpush1.bf16.msra.mxu1 %v4142_v59 }
 0x2f0   :  { %2848 = vmatprep.subr.bf16.mxu0 %v4147_v60  ;;  %2930 = vmatprep.subr.bf16.mxu1 %v4150_v61 }
 0x2f3   :  { %2849 = vmatpush1.bf16.msra.mxu0 %v4145_v62  ;;  %2931 = vmatpush1.bf16.msra.mxu1 %v4148_v63 }
 0x2f4   :  { %2850 = vmatprep.subr.bf16.mxu0 %v4153_v0  ;;  %2932 = vmatprep.subr.bf16.mxu1 %v4156_v1 }
 0x2f7   :  { %2851 = vmatpush1.bf16.msra.mxu0 %v4151_v2  ;;  %2933 = vmatpush1.bf16.msra.mxu1 %v4154_v3 }
 0x2f8   :  { %2852 = vmatprep.subr.bf16.mxu0 %v4159_v5  ;;  %2934 = vmatprep.subr.bf16.mxu1 %v4162_v6 }
 0x2fb   :  { %2853 = vmatpush1.bf16.msra.mxu0 %v4157_v7  ;;  %2935 = vmatpush1.bf16.msra.mxu1 %v4160_v8 }
 0x2fc   :  { %2854 = vmatprep.subr.bf16.mxu0 %v4165_v10  ;;  %2936 = vmatprep.subr.bf16.mxu1 %v4168_v16 }
 0x2ff   :  { %2855 = vmatpush1.bf16.msra.mxu0 %v4163_v17  ;;  %2937 = vmatpush1.bf16.msra.mxu1 %v4166_v18 }
 0x302   :  { %2857 = vmatmul.mubr.bf16.vlgmr.msra.gmra.mrb[8].mxu0 %v2013_v50  ;;  %2939 = vmatmul.mubr.bf16.vlgmr.msra.gmra.mrb[8].mxu1 %v2013_v50 }
 0x3d5   :  { %v4452_v21 = vpop.f32.mrb[8].mxu0  ;;  %v4454_v55 = vpop.f32.mrb[8].mxu1 }
 0x3d6   :  { %v2952_v22 = vsel %vm2949_vm0, %v4452_v21, 0.0  ;;  %v2954_v23 = vsel %vm2949_vm0, %v4454_v55, 0.0  ;;  %v4462_v24 = vpop.f32.mrb[9].mxu0  ;;  %v4464_v25 = vpop.f32.mrb[9].mxu1 }
 0x3d7   :  { %v2956_v26 = vrot.slane %v2952_v22, 4  ;;  %v2968_v27 = vrot.slane %v2954_v23, 4  ;;  %v2953_v29 = vsel %vm2949_vm0, %v4462_v24, 0.0  ;;  %v2955_v30 = vsel %vm2949_vm0, %v4464_v25, 0.0  ;;  %v2862_v31 = vpop.f32.mrb[10].mxu0  ;;  %v2944_v32 = vpop.f32.mrb[10].mxu1 }
 0x3d8   :  { %v2962_v33 = vrot.slane %v2953_v29, 4  ;;  %v2974_v34 = vrot.slane %v2955_v30, 4  ;;  %v2863_v35 = vpop.f32.mrb[11].mxu0  ;;  %v2945_v36 = vpop.f32.mrb[11].mxu1 }
 0x3d9   :  { %v2957_v37 = vadd.f32 %v2956_v26, %v2952_v22  ;;  %v2969_v38 = vadd.f32 %v2968_v27, %v2954_v23 }
 0x3da   :  { %v2963_v39 = vadd.f32 %v2962_v33, %v2953_v29  ;;  %v2975_v40 = vadd.f32 %v2974_v34, %v2955_v30 }
 0x3db   :  { %v2958_v41 = vrot.slane %v2957_v37, 2  ;;  %v2970_v42 = vrot.slane %v2969_v38, 2 }
 0x3dc   :  { %v2964_v43 = vrot.slane %v2963_v39, 2  ;;  %v2976_v13 = vrot.slane %v2975_v40, 2 }
 0x3dd   :  { %v2959_v44 = vadd.f32 %v2958_v41, %v2957_v37  ;;  %v2971_v45 = vadd.f32 %v2970_v42, %v2969_v38 }
 0x3de   :  { %v2965_v46 = vadd.f32 %v2964_v43, %v2963_v39  ;;  %v2977_v47 = vadd.f32 %v2976_v13, %v2975_v40 }
 0x3df   :  { %v2960_v20 = vrot.slane %v2959_v44, 1  ;;  %v2972_v48 = vrot.slane %v2971_v45, 1 }
 0x3e0   :  { %v2966_v49 = vrot.slane %v2965_v46, 1  ;;  %v2978_v51 = vrot.slane %v2977_v47, 1 }
 0x3e1   :  { %v2961_v52 = vadd.f32 %v2960_v20, %v2959_v44  ;;  %v2973_v53 = vadd.f32 %v2972_v48, %v2971_v45  ;;  %v4301_v48 = vmov 1966171168  }
 0x3e2   :  { %v2967_v54 = vadd.f32 %v2966_v49, %v2965_v46  ;;  %v2979_v56 = vadd.f32 %v2978_v51, %v2977_v47  ;;  %v3040_v49 = vunpack.c.l.s4 %v4301_v48 }
 0x3e3   :  { %v4472_v57 = vmul.f32 0.16666667, %v2961_v52  ;;  %v4474_v58 = vmul.f32 0.16666667, %v2973_v53 }
 0x3e4   :  { %v4476_v59 = vmul.f32 0.16666667, %v2967_v54  ;;  %v4478_v60 = vmul.f32 0.16666667, %v2979_v56  ;;  %v3041_v51 = vunpack.c.0.s8 %v3040_v49 }
 0x3e5   :  { %v2984_v61 = vsub.f32 %v4452_v21, %v4472_v57  ;;  %v2986_v62 = vsub.f32 %v4454_v55, %v4474_v58 }
 0x3e6   :  { %v2985_v63 = vsub.f32 %v4462_v24, %v4476_v59  ;;  %v2987_v0 = vsub.f32 %v4464_v25, %v4478_v60  ;;  %v3044_v54 = vsub.s32 %v3041_v51, %v4405_v11 }
 0x3e7   :  { %v2988_v1 = vsel %vm2949_vm0, %v2984_v61, 0.0  ;;  %v2990_v2 = vsel %vm2949_vm0, %v2986_v62, 0.0 }
 0x3e8   :  { %v2992_v3 = vmul.f32 %v2988_v1, %v2988_v1  ;;  %v2994_v4 = vmul.f32 %v2990_v2, %v2990_v2  ;;  %v2989_v5 = vsel %vm2949_vm0, %v2985_v63, 0.0  ;;  %v2991_v6 = vsel %vm2949_vm0, %v2987_v0, 0.0 }
 0x3e9   :  { %v2993_v7 = vmul.f32 %v2989_v5, %v2989_v5  ;;  %v2995_v8 = vmul.f32 %v2991_v6, %v2991_v6 }
 0x3ea   :  { %v2996_v9 = vrot.slane %v2992_v3, 4  ;;  %v3008_v10 = vrot.slane %v2994_v4, 4 }
 0x3eb   :  { %v3002_v16 = vrot.slane %v2993_v7, 4  ;;  %v3014_v17 = vrot.slane %v2995_v8, 4 }
 0x3ec   :  { %v2997_v18 = vadd.f32 %v2996_v9, %v2992_v3  ;;  %v3009_v19 = vadd.f32 %v3008_v10, %v2994_v4  ;;  %v3032_v3 = vld [vmem:[%s4537_s6] sm:$0xf] }
 0x3ed   :  { %v3003_v50 = vadd.f32 %v3002_v16, %v2993_v7  ;;  %v3015_v22 = vadd.f32 %v3014_v17, %v2995_v8 }
 0x3ee   :  { %v2998_v23 = vrot.slane %v2997_v18, 2  ;;  %v3010_v26 = vrot.slane %v3009_v19, 2 }
 0x3ef   :  { %v3004_v27 = vrot.slane %v3003_v50, 2  ;;  %v3016_v29 = vrot.slane %v3015_v22, 2 }
 0x3f0   :  { %v2999_v30 = vadd.f32 %v2998_v23, %v2997_v18  ;;  %v3011_v31 = vadd.f32 %v3010_v26, %v3009_v19 }
 0x3f1   :  { %v3005_v32 = vadd.f32 %v3004_v27, %v3003_v50  ;;  %v3017_v33 = vadd.f32 %v3016_v29, %v3015_v22 }
 0x3f2   :  { %v3000_v34 = vrot.slane %v2999_v30, 1  ;;  %v3012_v35 = vrot.slane %v3011_v31, 1 }
 0x3f3   :  { %v3006_v36 = vrot.slane %v3005_v32, 1  ;;  %v3018_v37 = vrot.slane %v3017_v33, 1 }
 0x3f4   :  { %v3001_v38 = vadd.f32 %v3000_v34, %v2999_v30  ;;  %v3013_v39 = vadd.f32 %v3012_v35, %v3011_v31 }
 0x3f5   :  { %v3007_v40 = vadd.f32 %v3006_v36, %v3005_v32  ;;  %v3019_v41 = vadd.f32 %v3018_v37, %v3017_v33 }
 0x3f6   :  { %v3020_v42 = vmul.f32 0.16666667, %v3001_v38  ;;  %v3022_v43 = vmul.f32 0.16666667, %v3013_v39 }
 0x3f7   :  { %v3021_v13 = vmul.f32 0.16666667, %v3007_v40  ;;  %v3023_v44 = vmul.f32 0.16666667, %v3019_v41 }
 0x3f8   :  { %v3024_v45 = vadd.f32 1e-05, %v3020_v42  ;;  %v3026_v46 = vadd.f32 1e-05, %v3022_v43 }
 0x3f9   :  { %v3025_v47 = vadd.f32 1e-05, %v3021_v13  ;;  %v3027_v20 = vadd.f32 1e-05, %v3023_v44 }
 0x3fa   :  { %4169 = vrsqrt.f32 %v3024_v45 }
 0x3fb   :  { %4171 = vrsqrt.f32 %v3026_v46 }
 0x3fc   :  { %4173 = vrsqrt.f32 %v3025_v47 }
 0x3fd   :  { %4175 = vrsqrt.f32 %v3027_v20 }
 0x404   :  { %v4170_v52 = vpop.eup %4169 }
 0x405   :  { %v4172_v53 = vpop.eup %4171 }
 0x406   :  { %v4174_v56 = vpop.eup %4173 }
 0x407   :  { %v4176_v61 = vpop.eup %4175  ;;  %v3037_v62 = vcombine.low %v4170_v52, %v4174_v56 }
 0x408   :  { %v3038_v63 = vcombine.low %v4172_v53, %v4176_v61 }
 0x409   :  { %v3045_v0 = vrot.slane %v3037_v62, %v3044_v54 }
 0x40a   :  { %v3052_v1 = vrot.slane %v3038_v63, %v3044_v54 }
 0x40c   :  { %v3053_v2 = vcombine.low %v3045_v0, %v3052_v1 }
 0x40e   :  { %v3060_v4 = vrot.slane %v3053_v2, %v3044_v54 }
 0x410   :  { %v3062_v5 = vmul.f32 %v3060_v4, %v3032_v3 }
 0x412   :  { %v3068_v6 = vrot.slane %v3062_v5, %v4408_v12  ;;  %v3072_v7 = vrot.slane %v3062_v5, %v4416_v14  ;;  %v3076_v8 = vrot.slane %v3062_v5, %v4430_v28  ;;  %v3080_v11 = vrot.slane %v3062_v5, %v4419_v15 }
 0x414   :  { %v3085_v9 = vmul.f32 %v3068_v6, %v4472_v57  ;;  %v3086_v10 = vmul.f32 %v3072_v7, %v4476_v59  ;;  %v3087_v16 = vmul.f32 %v3076_v8, %v4474_v58  ;;  %v3088_v17 = vmul.f32 %v3080_v11, %v4478_v60  ;;  %v3063_v57 = vld [vmem:[%s4538_s7] sm:$0xf]  ;;  %s4265_s7 = scalar_lea.vmem %s3159_s12, 512 }
 0x415   :  { %v3122_v18 = vmul.f32 %v3080_v11, %v4464_v25  ;;  %v3119_v19 = vmul.f32 %v3068_v6, %v4452_v21  ;;  %v3120_v50 = vmul.f32 %v3072_v7, %v4462_v24  ;;  %v3121_v22 = vmul.f32 %v3076_v8, %v4454_v55  ;;  %p4266_p4 = scmp.ne.s32.totalorder %s3159_s12, %s4265_s7  ;;  %p4271_p6 = scmp.lt.s32.totalorder %s4265_s7, %s4265_s7 }
 0x416   :  { %v3093_v23 = vcombine.low %v3085_v9, %v3086_v10  ;;  %v3094_v26 = vcombine.low %v3087_v16, %v3088_v17 }
 0x417   :  { %p4272_p7 = por %p4271_p6, %p4270_p5 }
 0x418   :  { %v3101_v27 = vrot.slane %v3093_v23, %v3044_v54  ;;  %v3108_v29 = vrot.slane %v3094_v26, %v3044_v54 }
 0x419   :  { %p4273_p8 = pnand %p4272_p7, %p4266_p4 }
 0x41a   :  { %v3109_v30 = vcombine.low %v3101_v27, %v3108_v29 }
 0x41c   :  { %v3116_v58 = vrot.slane %v3109_v30, %v3044_v54 }
 0x41e   :  { %v3118_v59 = vsub.f32 %v3063_v57, %v3116_v58 }
 0x420   :  { %v3139_v25 = vrot.slane %v3118_v59, %v4419_v15  ;;  %v3127_v21 = vrot.slane %v3118_v59, %v4408_v12  ;;  %v3131_v24 = vrot.slane %v3118_v59, %v4416_v14  ;;  %v3135_v55 = vrot.slane %v3118_v59, %v4430_v28 }
 0x422   :  { %v3147_v60 = vadd.f32 %v3139_v25, %v3122_v18  ;;  %v3144_v31 = vadd.f32 %v3127_v21, %v3119_v19  ;;  %v3145_v32 = vadd.f32 %v3131_v24, %v3120_v50  ;;  %v3146_v33 = vadd.f32 %v3135_v55, %v3121_v22 }
 0x424   :  { %3151 = vst [vmem:[#allocation10 + $0x18] sm:$0xff] %v3147_v60  ;;  %3148 = vst [vmem:[#allocation10] sm:$0xff] %v3144_v31 }
 0x425   :  { %3149 = vst [vmem:[#allocation10 + $0x8] sm:$0xff] %v3145_v32  ;;  %3150 = vst [vmem:[#allocation10 + $0x10] sm:$0xff] %v3146_v33 }
 0x426   :  { %4276 = shalt.err (!%p4273_p8)
}
 0x427   :  { %s4277_s17 = scalar_lea.hbm %s4539_s8, 512 }
 0x428   :  { %p4278_p9 = scmp.ne.s32.totalorder %s4539_s8, %s4277_s17  ;;  %p4281_p10 = scmp.lt.u32.totalorder %s4277_s17, %s4539_s8 }
 0x42a   :  { %p4283_p11 = pnand %p4281_p10, %p4278_p9 }
 0x42c   :  { %4286 = shalt.err (!%p4283_p11)
}
 0x42d   :  { %3161 = dma.vmem_to_hbm [thread:$0]  %s3159_s12, 512, %s4539_s8, [#allocation4]  }
 0x42e   :  { %4293 = dma.done.wait [#allocation4], 512  }
 0x42f   :  { %4294 = vsyncadd [#allocation4], 4294966784 }
 0x430   :  { %3165 = vsyncpa [#allocation3], 1 }
 0x431   :  { %3166 = vsyncpa [#allocation6], 1 }
 0x432   :  { %3167 = vsyncpa [#allocation9], 1 }
 0x433   :  { %3168 = vsyncpa [#allocation4], 1 }

</bundles_post_ra>
